<compile_context>
chip_gen: v6e
topology: v6e:2x2x1
jax: 0.10.0
libtpu: 0.0.40
codegen_flags: <defaults>
</compile_context>

<pallas_src>
import jax
import jax.numpy as jnp
import numpy as np
from jax import lax
from jax.experimental import pallas as pl
from jax.experimental.pallas import tpu as pltpu

# ---- module hyperparameters (small, deterministic synthetic config) ----
DIM = 32          # channel dim ("dim")
DIM_HEAD = 16     # dim_head (module default)
HEADS = 4         # heads (module default is 8; smaller for the example)
DIM_INNER = DIM_HEAD * HEADS
EPS = 1e-5
SCALE = DIM_HEAD ** -0.5
SQRT_HALF = 0.5 ** 0.5


def _taylor_attn_kernel(x_ref, wq_ref, wk_ref, wv_ref, wo_ref, o_ref):
    """One batch per grid step; all heads fused.

    x_ref : (1, N, C)   channels-last tokens of batch b
    wq/wk/wv_ref : (H, C, d)  per-head projection weights (VMEM resident)
    wo_ref: (H, d, C)   per-head slices of the to_out weight (VMEM resident)
    o_ref : (1, N, C)   output tile, written once per batch
    """
    x = x_ref[0]                               # (N, C) f32
    heads = wq_ref.shape[0]

    acc = None
    for h in range(heads):                     # static, unrolled head loop
        wq = wq_ref[h]                         # (C, d)
        wk = wk_ref[h]
        wv = wv_ref[h]
        wo = wo_ref[h]                         # (d, C)

        q = jnp.dot(x, wq, preferred_element_type=jnp.float32) * SCALE   # (N, d)
        k = jnp.dot(x, wk, preferred_element_type=jnp.float32)           # (N, d)
        v = jnp.dot(x, wv, preferred_element_type=jnp.float32)           # (N, d)

        # scores via the exact Taylor kernel trick (contract the head dim;
        # no transpose, no feature expansion).
        qk = lax.dot_general(q, k, (((1,), (1,)), ((), ())),
                             preferred_element_type=jnp.float32)         # (N, N)
        s = 1.0 + qk + 0.5 * qk * qk                                     # (N, N)

        num = jnp.dot(s, v, preferred_element_type=jnp.float32)          # (N, d)
        den = jnp.sum(s, axis=-1, keepdims=True)                         # (N, 1)
        inv = pl.reciprocal(jnp.maximum(den, EPS), approx=True)          # EUP slot
        out_h = num * inv                                                # (N, d)

        # per-head slice of the combine-heads projection, accumulated in f32
        contrib = jnp.dot(out_h, wo, preferred_element_type=jnp.float32)  # (N, C)
        acc = contrib if acc is None else acc + contrib

    o_ref[0] = acc.astype(o_ref.dtype)          # single store per batch


def taylor_attn_tokens(x_tokens, wq, wk, wv, wo):
    # layout: x_tokens is (B, N, C); weights are per-head (H, C, d) / (H, d, C).
    B, N, C = x_tokens.shape
    H, _, d = wq.shape
    return pl.pallas_call(
        _taylor_attn_kernel,
        out_shape=jax.ShapeDtypeStruct((B, N, C), jnp.float32),
        grid_spec=pltpu.PrefetchScalarGridSpec(
            num_scalar_prefetch=0,
            grid=(B,),
            in_specs=[
                pl.BlockSpec((1, N, C), lambda b: (b, 0, 0)),
                # weights total ~32 KiB: keep fully resident, no per-step DMA
                pl.BlockSpec((H, C, d), lambda b: (0, 0, 0)),
                pl.BlockSpec((H, C, d), lambda b: (0, 0, 0)),
                pl.BlockSpec((H, C, d), lambda b: (0, 0, 0)),
                pl.BlockSpec((H, d, C), lambda b: (0, 0, 0)),
            ],
            out_specs=pl.BlockSpec((1, N, C), lambda b: (b, 0, 0)),
        ),
        compiler_params=pltpu.CompilerParams(
            dimension_semantics=("parallel",)),   # B=2 -> both v7x TCs busy
    )(x_tokens, wq, wk, wv, wo)


def channel_first_taylor_attn(x_nchw, wq, wk, wv, wo):
    # ChannelFirstTaylorSeriesLinearAttn.forward: NCHW -> (B, N, C) -> NCHW
    B, C, Hs, Ws = x_nchw.shape
    tokens = jnp.transpose(x_nchw, (0, 2, 3, 1)).reshape(B, Hs * Ws, C)
    out = taylor_attn_tokens(tokens, wq, wk, wv, wo)
    return jnp.transpose(out.reshape(B, Hs, Ws, C), (0, 3, 1, 2))


def init_params(key, dim, heads, dim_head):
    """Deterministic init mirroring nn.Linear shapes / einops column layouts."""
    kq, kkv, ko = jax.random.split(key, 3)
    dim_inner = heads * dim_head
    bq = 1.0 / (dim ** 0.5)
    wq_full = jax.random.uniform(kq, (dim, dim_inner), jnp.float32, -bq, bq)
    wkv_full = jax.random.uniform(kkv, (dim, 2 * dim_inner), jnp.float32, -bq, bq)
    bo = 1.0 / (dim_inner ** 0.5)
    wo_full = jax.random.uniform(ko, (dim_inner, dim), jnp.float32, -bo, bo)

    # to_q: 'b n (h d) -> b h n d'
    wq = jnp.transpose(wq_full.reshape(dim, heads, dim_head), (1, 0, 2))     # (H, C, d)
    # to_kv: 'b n (kv h d) -> kv b h n d'
    wkv = wkv_full.reshape(dim, 2, heads, dim_head)
    wk = jnp.transpose(wkv[:, 0], (1, 0, 2))                                 # (H, C, d)
    wv = jnp.transpose(wkv[:, 1], (1, 0, 2))                                 # (H, C, d)
    # merge_heads 'b h n d -> b n (h d)' then to_out Linear(dim_inner, dim)
    wo = wo_full.reshape(heads, dim_head, dim)                               # (H, d, C)
    return wq, wk, wv, wo


# ---- pure-JAX reference mirroring the PyTorch code (for a sanity check) ----
def _taylor_expand_ref(t):
    d = t.shape[-1]
    x0 = jnp.ones(t.shape[:-1] + (1,), t.dtype)
    x2 = (t[..., :, None] * t[..., None, :]) * SQRT_HALF
    x2 = x2.reshape(t.shape[:-1] + (d * d,))
    return jnp.concatenate([x0, t, x2], axis=-1)


def reference(x_nchw, wq, wk, wv, wo):
    B, C, Hs, Ws = x_nchw.shape
    tokens = jnp.transpose(x_nchw, (0, 2, 3, 1)).reshape(B, Hs * Ws, C)
    q = jnp.einsum('bnc,hcd->bhnd', tokens, wq) * SCALE
    k = jnp.einsum('bnc,hcd->bhnd', tokens, wk)
    v = jnp.einsum('bnc,hcd->bhnd', tokens, wv)
    qe = _taylor_expand_ref(q)
    ke = _taylor_expand_ref(k)
    kv = jnp.einsum('bhnd,bhne->bhde', ke, v)
    qk_inv = 1.0 / jnp.maximum(jnp.einsum('bhnd,bhmd->bhn', qe, ke), EPS)
    out = jnp.einsum('bhnd,bhde,bhn->bhne', qe, kv, qk_inv)
    out = jnp.einsum('bhne,hec->bnc', out, wo)
    return jnp.transpose(out.reshape(B, Hs, Ws, C), (0, 3, 1, 2))


if __name__ == "__main__":
    key = jax.random.PRNGKey(0)
    kx, kp = jax.random.split(key)

    # NCHW input: batch=2, channels=DIM, spatial 8x8 -> seq N = 64
    x = jax.random.normal(kx, (2, DIM, 8, 8), jnp.float32)
    wq, wk, wv, wo = init_params(kp, DIM, HEADS, DIM_HEAD)

    out = channel_first_taylor_attn(x, wq, wk, wv, wo)
    out = jax.block_until_ready(out)
    assert out.shape == x.shape

    ref = reference(x, wq, wk, wv, wo)
    # slightly looser tolerance: pl.reciprocal(approx=True) on the denominator
    np.testing.assert_allclose(np.asarray(out), np.asarray(ref), rtol=2e-3, atol=2e-3)

    print("KERNEL_OK")
</pallas_src>

<mosaic_0001>
module attributes {stable_mosaic.version = 11 : i64} {
  func.func @_taylor_attn_kernel(%arg0: i32, %arg1: memref<1x64x32xf32, #tpu.memory_space<vmem>>, %arg2: memref<4x32x16xf32, #tpu.memory_space<vmem>>, %arg3: memref<4x32x16xf32, #tpu.memory_space<vmem>>, %arg4: memref<4x32x16xf32, #tpu.memory_space<vmem>>, %arg5: memref<4x16x32xf32, #tpu.memory_space<vmem>>, %arg6: memref<1x64x32xf32, #tpu.memory_space<vmem>>) attributes {dimension_semantics = [#tpu.dimension_semantics<parallel>], iteration_bounds = array<i64: 2>, scalar_prefetch = 0 : i64, scratch_operands = 0 : i64, tpu.core_type = #tpu.core_type<tc>, window_params = [{transform_indices = @transform_0, window_bounds = array<i64: 1, 64, 32>}, {pipeline_mode = #tpu.pipeline_mode<synchronous>, transform_indices = @transform_1, window_bounds = array<i64: 4, 32, 16>}, {pipeline_mode = #tpu.pipeline_mode<synchronous>, transform_indices = @transform_2, window_bounds = array<i64: 4, 32, 16>}, {pipeline_mode = #tpu.pipeline_mode<synchronous>, transform_indices = @transform_3, window_bounds = array<i64: 4, 32, 16>}, {pipeline_mode = #tpu.pipeline_mode<synchronous>, transform_indices = @transform_4, window_bounds = array<i64: 4, 16, 32>}, {transform_indices = @transform_5, window_bounds = array<i64: 1, 64, 32>}]} {
    %c0 = arith.constant 0 : index
    %c0_0 = arith.constant 0 : index
    %c0_1 = arith.constant 0 : index
    %0 = vector.load %arg1[%c0, %c0_0, %c0_1] : memref<1x64x32xf32, #tpu.memory_space<vmem>>, vector<1x64x32xf32>
    %1 = vector.shape_cast %0 : vector<1x64x32xf32> to vector<64x32xf32>
    %c0_2 = arith.constant 0 : index
    %c0_3 = arith.constant 0 : index
    %c0_4 = arith.constant 0 : index
    %2 = vector.load %arg2[%c0_2, %c0_3, %c0_4] : memref<4x32x16xf32, #tpu.memory_space<vmem>>, vector<1x32x16xf32>
    %3 = vector.shape_cast %2 : vector<1x32x16xf32> to vector<32x16xf32>
    %c0_5 = arith.constant 0 : index
    %c0_6 = arith.constant 0 : index
    %c0_7 = arith.constant 0 : index
    %4 = vector.load %arg3[%c0_5, %c0_6, %c0_7] : memref<4x32x16xf32, #tpu.memory_space<vmem>>, vector<1x32x16xf32>
    %5 = vector.shape_cast %4 : vector<1x32x16xf32> to vector<32x16xf32>
    %c0_8 = arith.constant 0 : index
    %c0_9 = arith.constant 0 : index
    %c0_10 = arith.constant 0 : index
    %6 = vector.load %arg4[%c0_8, %c0_9, %c0_10] : memref<4x32x16xf32, #tpu.memory_space<vmem>>, vector<1x32x16xf32>
    %7 = vector.shape_cast %6 : vector<1x32x16xf32> to vector<32x16xf32>
    %c0_11 = arith.constant 0 : index
    %c0_12 = arith.constant 0 : index
    %c0_13 = arith.constant 0 : index
    %8 = vector.load %arg5[%c0_11, %c0_12, %c0_13] : memref<4x16x32xf32, #tpu.memory_space<vmem>>, vector<1x16x32xf32>
    %9 = vector.shape_cast %8 : vector<1x16x32xf32> to vector<16x32xf32>
    %cst = arith.constant dense<0.000000e+00> : vector<64x16xf32>
    %10 = tpu.matmul %1, %3, %cst {dimension_numbers = #tpu.dot_dimension_numbers<[1], [0], [0], [1], [0, 0, 1, 1], [], []>} : vector<64x32xf32>, vector<32x16xf32>, vector<64x16xf32> -> vector<64x16xf32>
    %cst_14 = arith.constant 2.500000e-01 : f32
    %11 = vector.broadcast %cst_14 : f32 to vector<64x16xf32>
    %12 = arith.mulf %10, %11 : vector<64x16xf32>
    %cst_15 = arith.constant dense<0.000000e+00> : vector<64x16xf32>
    %13 = tpu.matmul %1, %5, %cst_15 {dimension_numbers = #tpu.dot_dimension_numbers<[1], [0], [0], [1], [0, 0, 1, 1], [], []>} : vector<64x32xf32>, vector<32x16xf32>, vector<64x16xf32> -> vector<64x16xf32>
    %cst_16 = arith.constant dense<0.000000e+00> : vector<64x16xf32>
    %14 = tpu.matmul %1, %7, %cst_16 {dimension_numbers = #tpu.dot_dimension_numbers<[1], [0], [0], [1], [0, 0, 1, 1], [], []>} : vector<64x32xf32>, vector<32x16xf32>, vector<64x16xf32> -> vector<64x16xf32>
    %cst_17 = arith.constant dense<0.000000e+00> : vector<64x64xf32>
    %15 = tpu.matmul %12, %13, %cst_17 {dimension_numbers = #tpu.dot_dimension_numbers<[1], [1], [0], [0], [0, 0, 1, 0], [], []>} : vector<64x16xf32>, vector<64x16xf32>, vector<64x64xf32> -> vector<64x64xf32>
    %cst_18 = arith.constant 1.000000e+00 : f32
    %16 = vector.broadcast %cst_18 : f32 to vector<64x64xf32>
    %17 = arith.addf %16, %15 : vector<64x64xf32>
    %cst_19 = arith.constant 5.000000e-01 : f32
    %18 = vector.broadcast %cst_19 : f32 to vector<64x64xf32>
    %19 = arith.mulf %18, %15 : vector<64x64xf32>
    %20 = arith.mulf %19, %15 : vector<64x64xf32>
    %21 = arith.addf %17, %20 : vector<64x64xf32>
    %cst_20 = arith.constant dense<0.000000e+00> : vector<64x16xf32>
    %22 = tpu.matmul %21, %14, %cst_20 {dimension_numbers = #tpu.dot_dimension_numbers<[1], [0], [0], [1], [0, 0, 1, 1], [], []>} : vector<64x64xf32>, vector<64x16xf32>, vector<64x16xf32> -> vector<64x16xf32>
    %cst_21 = arith.constant dense<0.000000e+00> : vector<64xf32>
    %23 = vector.multi_reduction <add>, %21, %cst_21 [1] : vector<64x64xf32> to vector<64xf32>
    %24 = vector.shape_cast %23 : vector<64xf32> to vector<64x1xf32>
    %cst_22 = arith.constant 9.99999974E-6 : f32
    %25 = vector.broadcast %cst_22 : f32 to vector<64x1xf32>
    %26 = arith.maximumf %24, %25 : vector<64x1xf32>
    %27 = tpu.reciprocal %26 {approx = true} : vector<64x1xf32> -> vector<64x1xf32>
    %28 = vector.broadcast %27 : vector<64x1xf32> to vector<64x16xf32>
    %29 = arith.mulf %22, %28 : vector<64x16xf32>
    %cst_23 = arith.constant dense<0.000000e+00> : vector<64x32xf32>
    %30 = tpu.matmul %29, %9, %cst_23 {dimension_numbers = #tpu.dot_dimension_numbers<[1], [0], [0], [1], [0, 0, 1, 1], [], []>} : vector<64x16xf32>, vector<16x32xf32>, vector<64x32xf32> -> vector<64x32xf32>
    %c1 = arith.constant 1 : index
    %c0_24 = arith.constant 0 : index
    %c0_25 = arith.constant 0 : index
    %31 = vector.load %arg2[%c1, %c0_24, %c0_25] : memref<4x32x16xf32, #tpu.memory_space<vmem>>, vector<1x32x16xf32>
    %32 = vector.shape_cast %31 : vector<1x32x16xf32> to vector<32x16xf32>
    %c1_26 = arith.constant 1 : index
    %c0_27 = arith.constant 0 : index
    %c0_28 = arith.constant 0 : index
    %33 = vector.load %arg3[%c1_26, %c0_27, %c0_28] : memref<4x32x16xf32, #tpu.memory_space<vmem>>, vector<1x32x16xf32>
    %34 = vector.shape_cast %33 : vector<1x32x16xf32> to vector<32x16xf32>
    %c1_29 = arith.constant 1 : index
    %c0_30 = arith.constant 0 : index
    %c0_31 = arith.constant 0 : index
    %35 = vector.load %arg4[%c1_29, %c0_30, %c0_31] : memref<4x32x16xf32, #tpu.memory_space<vmem>>, vector<1x32x16xf32>
    %36 = vector.shape_cast %35 : vector<1x32x16xf32> to vector<32x16xf32>
    %c1_32 = arith.constant 1 : index
    %c0_33 = arith.constant 0 : index
    %c0_34 = arith.constant 0 : index
    %37 = vector.load %arg5[%c1_32, %c0_33, %c0_34] : memref<4x16x32xf32, #tpu.memory_space<vmem>>, vector<1x16x32xf32>
    %38 = vector.shape_cast %37 : vector<1x16x32xf32> to vector<16x32xf32>
    %cst_35 = arith.constant dense<0.000000e+00> : vector<64x16xf32>
    %39 = tpu.matmul %1, %32, %cst_35 {dimension_numbers = #tpu.dot_dimension_numbers<[1], [0], [0], [1], [0, 0, 1, 1], [], []>} : vector<64x32xf32>, vector<32x16xf32>, vector<64x16xf32> -> vector<64x16xf32>
    %cst_36 = arith.constant 2.500000e-01 : f32
    %40 = vector.broadcast %cst_36 : f32 to vector<64x16xf32>
    %41 = arith.mulf %39, %40 : vector<64x16xf32>
    %cst_37 = arith.constant dense<0.000000e+00> : vector<64x16xf32>
    %42 = tpu.matmul %1, %34, %cst_37 {dimension_numbers = #tpu.dot_dimension_numbers<[1], [0], [0], [1], [0, 0, 1, 1], [], []>} : vector<64x32xf32>, vector<32x16xf32>, vector<64x16xf32> -> vector<64x16xf32>
    %cst_38 = arith.constant dense<0.000000e+00> : vector<64x16xf32>
    %43 = tpu.matmul %1, %36, %cst_38 {dimension_numbers = #tpu.dot_dimension_numbers<[1], [0], [0], [1], [0, 0, 1, 1], [], []>} : vector<64x32xf32>, vector<32x16xf32>, vector<64x16xf32> -> vector<64x16xf32>
    %cst_39 = arith.constant dense<0.000000e+00> : vector<64x64xf32>
    %44 = tpu.matmul %41, %42, %cst_39 {dimension_numbers = #tpu.dot_dimension_numbers<[1], [1], [0], [0], [0, 0, 1, 0], [], []>} : vector<64x16xf32>, vector<64x16xf32>, vector<64x64xf32> -> vector<64x64xf32>
    %cst_40 = arith.constant 1.000000e+00 : f32
    %45 = vector.broadcast %cst_40 : f32 to vector<64x64xf32>
    %46 = arith.addf %45, %44 : vector<64x64xf32>
    %cst_41 = arith.constant 5.000000e-01 : f32
    %47 = vector.broadcast %cst_41 : f32 to vector<64x64xf32>
    %48 = arith.mulf %47, %44 : vector<64x64xf32>
    %49 = arith.mulf %48, %44 : vector<64x64xf32>
    %50 = arith.addf %46, %49 : vector<64x64xf32>
    %cst_42 = arith.constant dense<0.000000e+00> : vector<64x16xf32>
    %51 = tpu.matmul %50, %43, %cst_42 {dimension_numbers = #tpu.dot_dimension_numbers<[1], [0], [0], [1], [0, 0, 1, 1], [], []>} : vector<64x64xf32>, vector<64x16xf32>, vector<64x16xf32> -> vector<64x16xf32>
    %cst_43 = arith.constant dense<0.000000e+00> : vector<64xf32>
    %52 = vector.multi_reduction <add>, %50, %cst_43 [1] : vector<64x64xf32> to vector<64xf32>
    %53 = vector.shape_cast %52 : vector<64xf32> to vector<64x1xf32>
    %cst_44 = arith.constant 9.99999974E-6 : f32
    %54 = vector.broadcast %cst_44 : f32 to vector<64x1xf32>
    %55 = arith.maximumf %53, %54 : vector<64x1xf32>
    %56 = tpu.reciprocal %55 {approx = true} : vector<64x1xf32> -> vector<64x1xf32>
    %57 = vector.broadcast %56 : vector<64x1xf32> to vector<64x16xf32>
    %58 = arith.mulf %51, %57 : vector<64x16xf32>
    %cst_45 = arith.constant dense<0.000000e+00> : vector<64x32xf32>
    %59 = tpu.matmul %58, %38, %cst_45 {dimension_numbers = #tpu.dot_dimension_numbers<[1], [0], [0], [1], [0, 0, 1, 1], [], []>} : vector<64x16xf32>, vector<16x32xf32>, vector<64x32xf32> -> vector<64x32xf32>
    %60 = arith.addf %30, %59 : vector<64x32xf32>
    %c2 = arith.constant 2 : index
    %c0_46 = arith.constant 0 : index
    %c0_47 = arith.constant 0 : index
    %61 = vector.load %arg2[%c2, %c0_46, %c0_47] : memref<4x32x16xf32, #tpu.memory_space<vmem>>, vector<1x32x16xf32>
    %62 = vector.shape_cast %61 : vector<1x32x16xf32> to vector<32x16xf32>
    %c2_48 = arith.constant 2 : index
    %c0_49 = arith.constant 0 : index
    %c0_50 = arith.constant 0 : index
    %63 = vector.load %arg3[%c2_48, %c0_49, %c0_50] : memref<4x32x16xf32, #tpu.memory_space<vmem>>, vector<1x32x16xf32>
    %64 = vector.shape_cast %63 : vector<1x32x16xf32> to vector<32x16xf32>
    %c2_51 = arith.constant 2 : index
    %c0_52 = arith.constant 0 : index
    %c0_53 = arith.constant 0 : index
    %65 = vector.load %arg4[%c2_51, %c0_52, %c0_53] : memref<4x32x16xf32, #tpu.memory_space<vmem>>, vector<1x32x16xf32>
    %66 = vector.shape_cast %65 : vector<1x32x16xf32> to vector<32x16xf32>
    %c2_54 = arith.constant 2 : index
    %c0_55 = arith.constant 0 : index
    %c0_56 = arith.constant 0 : index
    %67 = vector.load %arg5[%c2_54, %c0_55, %c0_56] : memref<4x16x32xf32, #tpu.memory_space<vmem>>, vector<1x16x32xf32>
    %68 = vector.shape_cast %67 : vector<1x16x32xf32> to vector<16x32xf32>
    %cst_57 = arith.constant dense<0.000000e+00> : vector<64x16xf32>
    %69 = tpu.matmul %1, %62, %cst_57 {dimension_numbers = #tpu.dot_dimension_numbers<[1], [0], [0], [1], [0, 0, 1, 1], [], []>} : vector<64x32xf32>, vector<32x16xf32>, vector<64x16xf32> -> vector<64x16xf32>
    %cst_58 = arith.constant 2.500000e-01 : f32
    %70 = vector.broadcast %cst_58 : f32 to vector<64x16xf32>
    %71 = arith.mulf %69, %70 : vector<64x16xf32>
    %cst_59 = arith.constant dense<0.000000e+00> : vector<64x16xf32>
    %72 = tpu.matmul %1, %64, %cst_59 {dimension_numbers = #tpu.dot_dimension_numbers<[1], [0], [0], [1], [0, 0, 1, 1], [], []>} : vector<64x32xf32>, vector<32x16xf32>, vector<64x16xf32> -> vector<64x16xf32>
    %cst_60 = arith.constant dense<0.000000e+00> : vector<64x16xf32>
    %73 = tpu.matmul %1, %66, %cst_60 {dimension_numbers = #tpu.dot_dimension_numbers<[1], [0], [0], [1], [0, 0, 1, 1], [], []>} : vector<64x32xf32>, vector<32x16xf32>, vector<64x16xf32> -> vector<64x16xf32>
    %cst_61 = arith.constant dense<0.000000e+00> : vector<64x64xf32>
    %74 = tpu.matmul %71, %72, %cst_61 {dimension_numbers = #tpu.dot_dimension_numbers<[1], [1], [0], [0], [0, 0, 1, 0], [], []>} : vector<64x16xf32>, vector<64x16xf32>, vector<64x64xf32> -> vector<64x64xf32>
    %cst_62 = arith.constant 1.000000e+00 : f32
    %75 = vector.broadcast %cst_62 : f32 to vector<64x64xf32>
    %76 = arith.addf %75, %74 : vector<64x64xf32>
    %cst_63 = arith.constant 5.000000e-01 : f32
    %77 = vector.broadcast %cst_63 : f32 to vector<64x64xf32>
    %78 = arith.mulf %77, %74 : vector<64x64xf32>
    %79 = arith.mulf %78, %74 : vector<64x64xf32>
    %80 = arith.addf %76, %79 : vector<64x64xf32>
    %cst_64 = arith.constant dense<0.000000e+00> : vector<64x16xf32>
    %81 = tpu.matmul %80, %73, %cst_64 {dimension_numbers = #tpu.dot_dimension_numbers<[1], [0], [0], [1], [0, 0, 1, 1], [], []>} : vector<64x64xf32>, vector<64x16xf32>, vector<64x16xf32> -> vector<64x16xf32>
    %cst_65 = arith.constant dense<0.000000e+00> : vector<64xf32>
    %82 = vector.multi_reduction <add>, %80, %cst_65 [1] : vector<64x64xf32> to vector<64xf32>
    %83 = vector.shape_cast %82 : vector<64xf32> to vector<64x1xf32>
    %cst_66 = arith.constant 9.99999974E-6 : f32
    %84 = vector.broadcast %cst_66 : f32 to vector<64x1xf32>
    %85 = arith.maximumf %83, %84 : vector<64x1xf32>
    %86 = tpu.reciprocal %85 {approx = true} : vector<64x1xf32> -> vector<64x1xf32>
    %87 = vector.broadcast %86 : vector<64x1xf32> to vector<64x16xf32>
    %88 = arith.mulf %81, %87 : vector<64x16xf32>
    %cst_67 = arith.constant dense<0.000000e+00> : vector<64x32xf32>
    %89 = tpu.matmul %88, %68, %cst_67 {dimension_numbers = #tpu.dot_dimension_numbers<[1], [0], [0], [1], [0, 0, 1, 1], [], []>} : vector<64x16xf32>, vector<16x32xf32>, vector<64x32xf32> -> vector<64x32xf32>
    %90 = arith.addf %60, %89 : vector<64x32xf32>
    %c3 = arith.constant 3 : index
    %c0_68 = arith.constant 0 : index
    %c0_69 = arith.constant 0 : index
    %91 = vector.load %arg2[%c3, %c0_68, %c0_69] : memref<4x32x16xf32, #tpu.memory_space<vmem>>, vector<1x32x16xf32>
    %92 = vector.shape_cast %91 : vector<1x32x16xf32> to vector<32x16xf32>
    %c3_70 = arith.constant 3 : index
    %c0_71 = arith.constant 0 : index
    %c0_72 = arith.constant 0 : index
    %93 = vector.load %arg3[%c3_70, %c0_71, %c0_72] : memref<4x32x16xf32, #tpu.memory_space<vmem>>, vector<1x32x16xf32>
    %94 = vector.shape_cast %93 : vector<1x32x16xf32> to vector<32x16xf32>
    %c3_73 = arith.constant 3 : index
    %c0_74 = arith.constant 0 : index
    %c0_75 = arith.constant 0 : index
    %95 = vector.load %arg4[%c3_73, %c0_74, %c0_75] : memref<4x32x16xf32, #tpu.memory_space<vmem>>, vector<1x32x16xf32>
    %96 = vector.shape_cast %95 : vector<1x32x16xf32> to vector<32x16xf32>
    %c3_76 = arith.constant 3 : index
    %c0_77 = arith.constant 0 : index
    %c0_78 = arith.constant 0 : index
    %97 = vector.load %arg5[%c3_76, %c0_77, %c0_78] : memref<4x16x32xf32, #tpu.memory_space<vmem>>, vector<1x16x32xf32>
    %98 = vector.shape_cast %97 : vector<1x16x32xf32> to vector<16x32xf32>
    %cst_79 = arith.constant dense<0.000000e+00> : vector<64x16xf32>
    %99 = tpu.matmul %1, %92, %cst_79 {dimension_numbers = #tpu.dot_dimension_numbers<[1], [0], [0], [1], [0, 0, 1, 1], [], []>} : vector<64x32xf32>, vector<32x16xf32>, vector<64x16xf32> -> vector<64x16xf32>
    %cst_80 = arith.constant 2.500000e-01 : f32
    %100 = vector.broadcast %cst_80 : f32 to vector<64x16xf32>
    %101 = arith.mulf %99, %100 : vector<64x16xf32>
    %cst_81 = arith.constant dense<0.000000e+00> : vector<64x16xf32>
    %102 = tpu.matmul %1, %94, %cst_81 {dimension_numbers = #tpu.dot_dimension_numbers<[1], [0], [0], [1], [0, 0, 1, 1], [], []>} : vector<64x32xf32>, vector<32x16xf32>, vector<64x16xf32> -> vector<64x16xf32>
    %cst_82 = arith.constant dense<0.000000e+00> : vector<64x16xf32>
    %103 = tpu.matmul %1, %96, %cst_82 {dimension_numbers = #tpu.dot_dimension_numbers<[1], [0], [0], [1], [0, 0, 1, 1], [], []>} : vector<64x32xf32>, vector<32x16xf32>, vector<64x16xf32> -> vector<64x16xf32>
    %cst_83 = arith.constant dense<0.000000e+00> : vector<64x64xf32>
    %104 = tpu.matmul %101, %102, %cst_83 {dimension_numbers = #tpu.dot_dimension_numbers<[1], [1], [0], [0], [0, 0, 1, 0], [], []>} : vector<64x16xf32>, vector<64x16xf32>, vector<64x64xf32> -> vector<64x64xf32>
    %cst_84 = arith.constant 1.000000e+00 : f32
    %105 = vector.broadcast %cst_84 : f32 to vector<64x64xf32>
    %106 = arith.addf %105, %104 : vector<64x64xf32>
    %cst_85 = arith.constant 5.000000e-01 : f32
    %107 = vector.broadcast %cst_85 : f32 to vector<64x64xf32>
    %108 = arith.mulf %107, %104 : vector<64x64xf32>
    %109 = arith.mulf %108, %104 : vector<64x64xf32>
    %110 = arith.addf %106, %109 : vector<64x64xf32>
    %cst_86 = arith.constant dense<0.000000e+00> : vector<64x16xf32>
    %111 = tpu.matmul %110, %103, %cst_86 {dimension_numbers = #tpu.dot_dimension_numbers<[1], [0], [0], [1], [0, 0, 1, 1], [], []>} : vector<64x64xf32>, vector<64x16xf32>, vector<64x16xf32> -> vector<64x16xf32>
    %cst_87 = arith.constant dense<0.000000e+00> : vector<64xf32>
    %112 = vector.multi_reduction <add>, %110, %cst_87 [1] : vector<64x64xf32> to vector<64xf32>
    %113 = vector.shape_cast %112 : vector<64xf32> to vector<64x1xf32>
    %cst_88 = arith.constant 9.99999974E-6 : f32
    %114 = vector.broadcast %cst_88 : f32 to vector<64x1xf32>
    %115 = arith.maximumf %113, %114 : vector<64x1xf32>
    %116 = tpu.reciprocal %115 {approx = true} : vector<64x1xf32> -> vector<64x1xf32>
    %117 = vector.broadcast %116 : vector<64x1xf32> to vector<64x16xf32>
    %118 = arith.mulf %111, %117 : vector<64x16xf32>
    %cst_89 = arith.constant dense<0.000000e+00> : vector<64x32xf32>
    %119 = tpu.matmul %118, %98, %cst_89 {dimension_numbers = #tpu.dot_dimension_numbers<[1], [0], [0], [1], [0, 0, 1, 1], [], []>} : vector<64x16xf32>, vector<16x32xf32>, vector<64x32xf32> -> vector<64x32xf32>
    %120 = arith.addf %90, %119 : vector<64x32xf32>
    %c0_90 = arith.constant 0 : index
    %c0_91 = arith.constant 0 : index
    %c0_92 = arith.constant 0 : index
    %121 = vector.load %arg6[%c0_90, %c0_91, %c0_92] : memref<1x64x32xf32, #tpu.memory_space<vmem>>, vector<1x64x32xf32>
    %122 = vector.shape_cast %121 : vector<1x64x32xf32> to vector<64x32xf32>
    %123 = vector.shape_cast %120 : vector<64x32xf32> to vector<1x64x32xf32>
    tpu.vector_store %arg6[%c0_90, %c0_91, %c0_92], %123 {strides = array<i32>} : memref<1x64x32xf32, #tpu.memory_space<vmem>>, vector<1x64x32xf32>,
    return
  }
  func.func @transform_0(%arg0: i32) -> (i32, i32, i32) {
    %c0_i32 = arith.constant 0 : i32
    %c0_i32_0 = arith.constant 0 : i32
    %c0_i32_1 = arith.constant 0 : i32
    return %arg0, %c0_i32, %c0_i32_0 : i32, i32, i32
  }
  func.func @transform_1(%arg0: i32) -> (i32, i32, i32) {
    %c0_i32 = arith.constant 0 : i32
    %c0_i32_0 = arith.constant 0 : i32
    %c0_i32_1 = arith.constant 0 : i32
    %c0_i32_2 = arith.constant 0 : i32
    return %c0_i32, %c0_i32_0, %c0_i32_1 : i32, i32, i32
  }
  func.func @transform_2(%arg0: i32) -> (i32, i32, i32) {
    %c0_i32 = arith.constant 0 : i32
    %c0_i32_0 = arith.constant 0 : i32
    %c0_i32_1 = arith.constant 0 : i32
    %c0_i32_2 = arith.constant 0 : i32
    return %c0_i32, %c0_i32_0, %c0_i32_1 : i32, i32, i32
  }
  func.func @transform_3(%arg0: i32) -> (i32, i32, i32) {
    %c0_i32 = arith.constant 0 : i32
    %c0_i32_0 = arith.constant 0 : i32
    %c0_i32_1 = arith.constant 0 : i32
    %c0_i32_2 = arith.constant 0 : i32
    return %c0_i32, %c0_i32_0, %c0_i32_1 : i32, i32, i32
  }
  func.func @transform_4(%arg0: i32) -> (i32, i32, i32) {
    %c0_i32 = arith.constant 0 : i32
    %c0_i32_0 = arith.constant 0 : i32
    %c0_i32_1 = arith.constant 0 : i32
    %c0_i32_2 = arith.constant 0 : i32
    return %c0_i32, %c0_i32_0, %c0_i32_1 : i32, i32, i32
  }
  func.func @transform_5(%arg0: i32) -> (i32, i32, i32) {
    %c0_i32 = arith.constant 0 : i32
    %c0_i32_0 = arith.constant 0 : i32
    %c0_i32_1 = arith.constant 0 : i32
    return %arg0, %c0_i32, %c0_i32_0 : i32, i32, i32
  }
}

</mosaic_0001>

<bundles_post_ra>
// kernel: tpu_custom_call.1
= control target key start
LH: loop header
LB: loop body
LE: loop exit
PB: predicated region body
PF: predicated region fallthrough
CT: control target
= control target key end

     0   :  { %s4900_s18 = smov 0   ;;  %s5638_s0 = inlined_call_operand.vmem [shape: f32[2,64,32], index: 0, kind: input, shape index: {}]   ;;  %s5639_s1 = inlined_call_operand.vmem [shape: f32[4,32,16], index: 1, kind: input, shape index: {}]   ;;  %s5640_s2 = inlined_call_operand.vmem [shape: f32[4,32,16], index: 2, kind: input, shape index: {}]   ;;  %s5641_s3 = inlined_call_operand.vmem [shape: f32[4,32,16], index: 3, kind: input, shape index: {}]   ;;  %s5642_s4 = inlined_call_operand.vmem [shape: f32[4,16,32], index: 4, kind: input, shape index: {}]   ;;  %s5643_s5 = inlined_call_operand.vmem [shape: f32[2,64,32], index: 5, kind: output, shape index: {}]  }
   0x1 LB: > { %s3663_s19 = sadd.s32 4294967295, %s4868_s18   ;;  %p3667_p0 = scmp.ge.s32.totalorder %s4868_s18, 1  ;;  %s4868_s18 = sphi %s4900_s18, %s15_s18  }
   0x2   : > { %p187_p1 = scmp.lt.s32.totalorder %s4868_s18, 3 }
   0x4   : > { %p188_p2 = pnand %p3667_p0, %p187_p1 }
   0x5   : > { %p215_p3 = scmp.lt.s32.totalorder (!%p188_p2), %s3663_s19, 1 }
   0x6   : > { %191 = sbr.rel (%p188_p2) target bundleno = 2550 (0x9f6), region = 40 }
   0xb   : > { %v240_v0 = vld [vmem:[%s5640_s2 + $0x18] sm:$0xff]  ;;  %v239_v1 = vld [vmem:[%s5640_s2 + $0x10] sm:$0xff]  ;;  %v238_v4 = vld [vmem:[%s5640_s2 + $0x8] sm:$0xff]  ;;  %s5645_s19 = smov (!%p215_p3, %s3663_s19), 1  ;;  %vm247_vm0 = vcmask 261120   ;;  %vm595_vm1 = vcmask 130048  }
   0xc   : > { %4274 = vmatprep.subr.mxu1 %v240_v0  ;;  %v236_v2 = vld [vmem:[%s5639_s1 + $0x18] sm:$0xff]  ;;  %v235_v3 = vld [vmem:[%s5639_s1 + $0x10] sm:$0xff]  ;;  %v234_v5 = vld [vmem:[%s5639_s1 + $0x8] sm:$0xff]  ;;  %s3940_s9 = sshll.u32 %s5645_s19, 6  ;;  %vm781_vm2 = vcmask 523264  }
   0xd   : > { %4275 = vmatpush3.msra.mxu1 %v240_v0  ;;  %4254 = vmatprep.subr.mxu0 %v236_v2  ;;  %v237_v6 = vld [vmem:[%s5640_s2] sm:$0xff]  ;;  %s4937_s12 = scalar_lea.vmem %s5638_s0, %s3940_s9  ;;  %v244_v11 = vld [vmem:[%s5641_s3 + $0x18] sm:$0xff]  ;;  %v243_v14 = vld [vmem:[%s5641_s3 + $0x10] sm:$0xff]  ;;  %s224_s29 = scalar_lea.vmem %s5643_s5, %s3940_s9 }
   0xe   : > { %4276 = vmatprep.subr.mxu1 %v239_v1  ;;  %4255 = vmatpush3.msra.mxu0 %v236_v2  ;;  %v4940_v7 = vld [vmem:[%s4937_s12] sm:$0xff]  ;;  %v4943_v8 = vld [vmem:[%s4937_s12 + $0x8] sm:$0xff]  ;;  %v4951_v10 = vld [vmem:[%s4937_s12 + $0x10] sm:$0xff] }
   0xf   : > { %4277 = vmatpush3.msra.mxu1 %v239_v1  ;;  %4256 = vmatprep.subr.mxu0 %v235_v3  ;;  %v233_v9 = vld [vmem:[%s5639_s1] sm:$0xff]  ;;  %v4961_v12 = vld [vmem:[%s4937_s12 + $0x18] sm:$0xff]  ;;  %v4980_v15 = vld [vmem:[%s4937_s12 + $0x28] sm:$0xff] }
  0x10   : > { %4278 = vmatprep.subr.mxu1 %v238_v4  ;;  %4257 = vmatpush3.msra.mxu0 %v235_v3  ;;  %v4964_v13 = vld [vmem:[%s4937_s12 + $0x20] sm:$0xff]  ;;  %v4983_v16 = vld [vmem:[%s4937_s12 + $0x30] sm:$0xff]  ;;  %v242_v17 = vld [vmem:[%s5641_s3 + $0x8] sm:$0xff] }
  0x11   : > { %4279 = vmatpush3.msra.mxu1 %v238_v4  ;;  %4258 = vmatprep.subr.mxu0 %v234_v5  ;;  %v4997_v18 = vld [vmem:[%s4937_s12 + $0x38] sm:$0xff]  ;;  %v241_v19 = vld [vmem:[%s5641_s3] sm:$0xff]  ;;  %v3726_v48 = vld [vmem:[%s5640_s2 + $0x30] sm:$0xff] }
  0x12   : > { %4280 = vmatprep.subr.mxu1 %v237_v6  ;;  %4282 = vmatprep.mubr.msk.f32.mxu1 %vm247_vm0, %v4940_v7  ;;  %v3727_v45 = vld [vmem:[%s5640_s2 + $0x38] sm:$0xff]  ;;  %v3725_v50 = vld [vmem:[%s5640_s2 + $0x28] sm:$0xff]  ;;  %v3724_v52 = vld [vmem:[%s5640_s2 + $0x20] sm:$0xff] }
  0x13   : > { %4281 = vmatpush3.msra.mxu1 %v237_v6  ;;  %4259 = vmatpush3.msra.mxu0 %v234_v5  ;;  %v3723_v56 = vld [vmem:[%s5639_s1 + $0x38] sm:$0xff] }
  0x14   : > { %4283 = vmatmul.mubr.msk.f32.vlgmr.msra.gmra.mxu1 %vm247_vm0, %v4943_v8  ;;  %4260 = vmatprep.subr.mxu0 %v233_v9 }
  0x15   : > { %4285 = vmatprep.mubr.msk.f32.mxu1 %vm247_vm0, %v4951_v10  ;;  %4261 = vmatpush3.msra.mxu0 %v233_v9 }
  0x16   : > { %4262 = vmatprep.mubr.msk.f32.mxu0 %vm247_vm0, %v4940_v7  ;;  %4294 = vmatprep.subr.mxu0 %v244_v11 }
  0x17   : > { %4263 = vmatmul.mubr.msk.f32.vlgmr.msra.gmra.mxu0 %vm247_vm0, %v4943_v8 }
  0x18   : > { %4286 = vmatmul.mubr.msk.f32.gmra.mxu1 %vm247_vm0, %v4961_v12  ;;  %4265 = vmatprep.mubr.msk.f32.mxu0 %vm247_vm0, %v4951_v10 }
  0x19   : > { %4288 = vmatprep.mubr.msk.f32.mxu1 %vm247_vm0, %v4964_v13  ;;  %4295 = vmatpush3.msra.mxu0 %v244_v11 }
  0x1a   : > { %4296 = vmatprep.subr.mxu0 %v243_v14 }
  0x1b   : > { %4266 = vmatmul.mubr.msk.f32.gmra.mxu0 %vm247_vm0, %v4961_v12 }
  0x1c   : > { %4289 = vmatmul.mubr.msk.f32.gmra.mxu1 %vm247_vm0, %v4980_v15  ;;  %4268 = vmatprep.mubr.msk.f32.mxu0 %vm247_vm0, %v4964_v13 }
  0x1d   : > { %4291 = vmatprep.mubr.msk.f32.mxu1 %vm247_vm0, %v4983_v16  ;;  %4297 = vmatpush3.msra.mxu0 %v243_v14 }
  0x1e   : > { %4298 = vmatprep.subr.mxu0 %v242_v17 }
  0x1f   : > { %4269 = vmatmul.mubr.msk.f32.gmra.mxu0 %vm247_vm0, %v4980_v15 }
  0x20   : > { %4292 = vmatmul.mubr.msk.f32.gmra.mxu1 %vm247_vm0, %v4997_v18  ;;  %4271 = vmatprep.mubr.msk.f32.mxu0 %vm247_vm0, %v4983_v16 }
  0x21   : > { %4299 = vmatpush3.msra.mxu0 %v242_v17 }
  0x22   : > { %4300 = vmatprep.subr.mxu0 %v241_v19 }
  0x23   : > { %4272 = vmatmul.mubr.msk.f32.gmra.mxu0 %vm247_vm0, %v4997_v18 }
  0x24   : > { %4301 = vmatpush3.msra.mxu0 %v241_v19  ;;  %4302 = vmatprep.mubr.msk.f32.mxu0 %vm247_vm0, %v4940_v7 }
  0x27   : > { %4303 = vmatmul.mubr.msk.f32.vlgmr.msra.gmra.mxu0 %vm247_vm0, %v4943_v8 }
  0x28   : > { %4305 = vmatprep.mubr.msk.f32.mxu0 %vm247_vm0, %v4951_v10 }
  0x2b   : > { %4306 = vmatmul.mubr.msk.f32.gmra.mxu0 %vm247_vm0, %v4961_v12 }
  0x2c   : > { %4308 = vmatprep.mubr.msk.f32.mxu0 %vm247_vm0, %v4964_v13 }
  0x2f   : > { %4309 = vmatmul.mubr.msk.f32.gmra.mxu0 %vm247_vm0, %v4980_v15 }
  0x30   : > { %4311 = vmatprep.mubr.msk.f32.mxu0 %vm247_vm0, %v4983_v16 }
  0x33   : > { %4312 = vmatmul.mubr.msk.f32.gmra.mxu0 %vm247_vm0, %v4997_v18 }
  0xd4   : > { %v4284_v20 = vpop.f32.mrf.mxu1 }
  0xd6   : > { %v451_v21 = vpop.f32.mrf.mxu1 }
  0xd7   : > { %v4264_v22 = vpop.f32.mrf.mxu0 }
  0xd8   : > { %v4287_v23 = vpop.f32.mrf.mxu1  ;;  %v378_v47 = vmul.f32 0.25, %v4264_v22 }
  0xd9   : > { %v338_v24 = vpop.f32.mrf.mxu0 }
  0xda   : > { %v461_v25 = vpop.f32.mrf.mxu1  ;;  %v377_v26 = vmul.f32 0.25, %v338_v24 }
  0xdb   : > { %v4267_v27 = vpop.f32.mrf.mxu0 }
  0xdc   : > { %v4290_v28 = vpop.f32.mrf.mxu1  ;;  %4330 = vmatprep.mubr.msk.f32.mxu1 %vm595_vm1, %v377_v26  ;;  %v380_v51 = vmul.f32 0.25, %v4267_v27  ;;  %v3721_v26 = vld [vmem:[%s5639_s1 + $0x28] sm:$0xff] }
  0xdd   : > { %v348_v29 = vpop.f32.mrf.mxu0 }
  0xde   : > { %v471_v30 = vpop.f32.mrf.mxu1  ;;  %v379_v46 = vmul.f32 0.25, %v348_v29 }
  0xdf   : > { %v5027_v31 = vpop.f32.mrf.mxu0 }
  0xe0   : > { %v4293_v32 = vpop.f32.mrf.mxu1  ;;  %v382_v54 = vmul.f32 0.25, %v5027_v31 }
  0xe1   : > { %4314 = vmatprep.subr.msk.mxu1 %vm595_vm1, %v4293_v32  ;;  %v358_v33 = vpop.f32.mrf.mxu0 }
  0xe2   : > { %v481_v34 = vpop.f32.mrf.mxu1  ;;  %4315 = vmatpush3.xpose.msk.msra.mxu1 %vm595_vm1, %v4293_v32  ;;  %v381_v49 = vmul.f32 0.25, %v358_v33 }
  0xe3   : > { %4316 = vmatprep.subr.msk.mxu1 %vm595_vm1, %v481_v34  ;;  %v5032_v35 = vpop.f32.mrf.mxu0 }
  0xe4   : > { %v384_v55 = vmul.f32 0.25, %v5032_v35 }
  0xe5   : > { %v368_v36 = vpop.f32.mrf.mxu0 }
  0xe6   : > { %4317 = vmatpush3.xpose.msk.msra.mxu1 %vm595_vm1, %v481_v34  ;;  %v383_v53 = vmul.f32 0.25, %v368_v36 }
  0xe7   : > { %4318 = vmatprep.subr.msk.mxu1 %vm595_vm1, %v4290_v28  ;;  %v4304_v37 = vpop.f32.mrf.mxu0 }
  0xe9   : > { %v556_v38 = vpop.f32.mrf.mxu0 }
  0xea   : > { %4319 = vmatpush3.xpose.msk.msra.mxu1 %vm595_vm1, %v4290_v28 }
  0xeb   : > { %4320 = vmatprep.subr.msk.mxu1 %vm595_vm1, %v471_v30  ;;  %v4307_v39 = vpop.f32.mrf.mxu0 }
  0xed   : > { %v566_v40 = vpop.f32.mrf.mxu0 }
  0xee   : > { %4321 = vmatpush3.xpose.msk.msra.mxu1 %vm595_vm1, %v471_v30 }
  0xef   : > { %4322 = vmatprep.subr.msk.mxu1 %vm595_vm1, %v4287_v23  ;;  %v4310_v41 = vpop.f32.mrf.mxu0 }
  0xf1   : > { %v576_v42 = vpop.f32.mrf.mxu0 }
  0xf2   : > { %4323 = vmatpush3.xpose.msk.msra.mxu1 %vm595_vm1, %v4287_v23 }
  0xf3   : > { %4324 = vmatprep.subr.msk.mxu1 %vm595_vm1, %v461_v25  ;;  %v4313_v43 = vpop.f32.mrf.mxu0 }
  0xf4   : > { %4342 = vmatprep.subr.mxu0 %v4313_v43 }
  0xf5   : > { %v586_v44 = vpop.f32.mrf.mxu0  ;;  %4343 = vmatpush3.msra.mxu0 %v4313_v43 }
  0xf6   : > { %4325 = vmatpush3.xpose.msk.msra.mxu1 %vm595_vm1, %v461_v25  ;;  %4344 = vmatprep.subr.mxu0 %v586_v44 }
  0xf7   : > { %4326 = vmatprep.subr.msk.mxu1 %vm595_vm1, %v4284_v20  ;;  %4345 = vmatpush3.msra.mxu0 %v586_v44 }
  0xf8   : > { %4346 = vmatprep.subr.mxu0 %v4310_v41 }
  0xf9   : > { %4347 = vmatpush3.msra.mxu0 %v4310_v41 }
  0xfa   : > { %4327 = vmatpush3.xpose.msk.msra.mxu1 %vm595_vm1, %v4284_v20  ;;  %4348 = vmatprep.subr.mxu0 %v576_v42  ;;  %v3722_v20 = vld [vmem:[%s5639_s1 + $0x30] sm:$0xff] }
  0xfb   : > { %4328 = vmatprep.subr.msk.mxu1 %vm595_vm1, %v451_v21  ;;  %4349 = vmatpush3.msra.mxu0 %v576_v42 }
  0xfc   : > { %4350 = vmatprep.subr.mxu0 %v4307_v39 }
  0xfd   : > { %4351 = vmatpush3.msra.mxu0 %v4307_v39 }
  0xfe   : > { %4329 = vmatpush3.xpose.msk.msra.mxu1 %vm595_vm1, %v451_v21  ;;  %4352 = vmatprep.subr.mxu0 %v566_v40 }
  0xff   : > { %4390 = vmatprep.subr.mxu1 %v3727_v45  ;;  %4353 = vmatpush3.msra.mxu0 %v566_v40 }
 0x100   : > { %4354 = vmatprep.subr.mxu0 %v4304_v37 }
 0x101   : > { %4331 = vmatmul.mubr.msk.f32.vlgmr.msra.gmra.mxu1 %vm595_vm1, %v378_v47  ;;  %4355 = vmatpush3.msra.mxu0 %v4304_v37  ;;  %v3720_v37 = vld [vmem:[%s5639_s1 + $0x20] sm:$0xff] }
 0x102   : > { %4333 = vmatprep.mubr.msk.f32.mxu1 %vm595_vm1, %v379_v46  ;;  %4391 = vmatpush3.msra.mxu1 %v3727_v45 }
 0x103   : > { %4392 = vmatprep.subr.mxu1 %v3726_v48  ;;  %4356 = vmatprep.subr.mxu0 %v556_v38 }
 0x104   : > { %4393 = vmatpush3.msra.mxu1 %v3726_v48  ;;  %4357 = vmatpush3.msra.mxu0 %v556_v38 }
 0x105   : > { %4334 = vmatmul.mubr.msk.f32.gmra.mxu1 %vm595_vm1, %v380_v51  ;;  %4394 = vmatprep.subr.mxu1 %v3725_v50 }
 0x106   : > { %4336 = vmatprep.mubr.msk.f32.mxu1 %vm595_vm1, %v381_v49  ;;  %4395 = vmatpush3.msra.mxu1 %v3725_v50 }
 0x107   : > { %4396 = vmatprep.subr.mxu1 %v3724_v52  ;;  %4370 = vmatprep.subr.mxu0 %v3723_v56 }
 0x108   : > { %4397 = vmatpush3.msra.mxu1 %v3724_v52 }
 0x109   : > { %4337 = vmatmul.mubr.msk.f32.gmra.mxu1 %vm595_vm1, %v382_v54 }
 0x10a   : > { %4339 = vmatprep.mubr.msk.f32.mxu1 %vm595_vm1, %v383_v53 }
 0x10d   : > { %4340 = vmatmul.mubr.msk.f32.gmra.mxu1 %vm595_vm1, %v384_v55 }
 0x10e   : > { %4398 = vmatprep.mubr.msk.f32.mxu1 %vm247_vm0, %v4940_v7 }
 0x111   : > { %4399 = vmatmul.mubr.msk.f32.vlgmr.msra.gmra.mxu1 %vm247_vm0, %v4943_v8 }
 0x112   : > { %4401 = vmatprep.mubr.msk.f32.mxu1 %vm247_vm0, %v4951_v10 }
 0x115   : > { %4402 = vmatmul.mubr.msk.f32.gmra.mxu1 %vm247_vm0, %v4961_v12 }
 0x116   : > { %4404 = vmatprep.mubr.msk.f32.mxu1 %vm247_vm0, %v4964_v13 }
 0x119   : > { %4405 = vmatmul.mubr.msk.f32.gmra.mxu1 %vm247_vm0, %v4980_v15 }
 0x11a   : > { %4407 = vmatprep.mubr.msk.f32.mxu1 %vm247_vm0, %v4983_v16 }
 0x11d   : > { %4408 = vmatmul.mubr.msk.f32.gmra.mxu1 %vm247_vm0, %v4997_v18 }
 0x1c1   : > { %v4332_v57 = vpop.f32.mrf.mxu1 }
 0x1c2   : > { %v758_v58 = vmul.f32 0.5, %v4332_v57  ;;  %v750_v2 = vadd.f32 1.0, %v4332_v57 }
 0x1c3   : > { %v710_v59 = vpop.f32.mrf.mxu1 }
 0x1c4   : > { %v757_v60 = vmul.f32 0.5, %v710_v59  ;;  %v766_v61 = vmul.f32 %v4332_v57, %v758_v58  ;;  %v749_v63 = vadd.f32 1.0, %v710_v59 }
 0x1c5   : > { %v4335_v62 = vpop.f32.mrf.mxu1 }
 0x1c6   : > { %v765_v0 = vmul.f32 %v757_v60, %v710_v59  ;;  %v760_v1 = vmul.f32 0.5, %v4335_v62  ;;  %v774_v6 = vadd.f32 %v766_v61, %v750_v2  ;;  %v752_v21 = vadd.f32 1.0, %v4335_v62  ;;  %v3731_v60 = vld [vmem:[%s5641_s3 + $0x38] sm:$0xff]  ;;  %v3730_v61 = vld [vmem:[%s5641_s3 + $0x30] sm:$0xff] }
 0x1c7   : > { %v720_v3 = vpop.f32.mrf.mxu1 }
 0x1c8   : > { %v773_v4 = vadd.f32 %v765_v0, %v749_v63  ;;  %v759_v5 = vmul.f32 0.5, %v720_v3  ;;  %v768_v9 = vmul.f32 %v4335_v62, %v760_v1  ;;  %v751_v14 = vadd.f32 1.0, %v720_v3  ;;  %v3729_v62 = vld [vmem:[%s5641_s3 + $0x28] sm:$0xff]  ;;  %v3728_v63 = vld [vmem:[%s5641_s3 + $0x20] sm:$0xff] }
 0x1c9   : > { %v4338_v11 = vpop.f32.mrf.mxu1  ;;  %v914_v34 = vsel %vm781_vm2, %v774_v6, 0.0  ;;  %v246_v0 = vld [vmem:[%s5642_s4 + $0x8] sm:$0xff] }
 0x1ca   : > { %v767_v17 = vmul.f32 %v759_v5, %v720_v3  ;;  %v762_v19 = vmul.f32 0.5, %v4338_v11  ;;  %4358 = vmatprep.mubr.msk.f32.mxu0 %vm781_vm2, %v773_v4  ;;  %v911_v22 = vsel %vm781_vm2, %v773_v4, 0.0  ;;  %v776_v27 = vadd.f32 %v768_v9, %v752_v21 }
 0x1cb   : > { %v730_v23 = vpop.f32.mrf.mxu1  ;;  %4359 = vmatmul.mubr.msk.f32.vlgmr.msra.gmra.mxu0 %vm781_vm2, %v774_v6  ;;  %912 = vadd.xlane.f32.xlu0 %v911_v22  ;;  %v754_v33 = vadd.f32 1.0, %v4338_v11 }
 0x1cc   : > { %v775_v24 = vadd.f32 %v767_v17, %v751_v14  ;;  %v761_v25 = vmul.f32 0.5, %v730_v23  ;;  %4371 = vmatpush3.msra.mxu0 %v3723_v56  ;;  %v770_v28 = vmul.f32 %v4338_v11, %v762_v19  ;;  %v753_v30 = vadd.f32 1.0, %v730_v23 }
 0x1cd   : > { %v4341_v29 = vpop.f32.mrf.mxu1  ;;  %4372 = vmatprep.subr.mxu0 %v3722_v20  ;;  %v920_v47 = vsel %vm781_vm2, %v776_v27, 0.0 }
 0x1ce   : > { %v769_v31 = vmul.f32 %v761_v25, %v730_v23  ;;  %v764_v32 = vmul.f32 0.5, %v4341_v29  ;;  %4361 = vmatprep.mubr.msk.f32.mxu0 %vm781_vm2, %v775_v24  ;;  %4373 = vmatpush3.msra.mxu0 %v3722_v20  ;;  %v917_v35 = vsel %vm781_vm2, %v775_v24, 0.0  ;;  %v778_v40 = vadd.f32 %v770_v28, %v754_v33 }
 0x1cf   : > { %v740_v36 = vpop.f32.mrf.mxu1  ;;  %4362 = vmatmul.mubr.msk.f32.gmra.mxu0 %vm781_vm2, %v776_v27  ;;  %4374 = vmatprep.subr.mxu0 %v3721_v26  ;;  %v756_v46 = vadd.f32 1.0, %v4341_v29 }
 0x1d0   : > { %v777_v38 = vadd.f32 %v769_v31, %v753_v30  ;;  %915 = vadd.xlane.f32.xlu0 %v914_v34  ;;  %918 = vadd.xlane.f32.xlu1 %v917_v35  ;;  %v763_v39 = vmul.f32 0.5, %v740_v36  ;;  %v772_v41 = vmul.f32 %v4341_v29, %v764_v32  ;;  %v755_v43 = vadd.f32 1.0, %v740_v36  ;;  %v245_v31 = vld [vmem:[%s5642_s4] sm:$0xff] }
 0x1d1   : > { %4375 = vmatpush3.msra.mxu0 %v3721_v26  ;;  %v5103_v42 = vpop.f32.mrf.mxu1  ;;  %v926_v53 = vsel %vm781_vm2, %v778_v40, 0.0 }
 0x1d2   : > { %v771_v44 = vmul.f32 %v763_v39, %v740_v36  ;;  %4364 = vmatprep.mubr.msk.f32.mxu0 %vm781_vm2, %v777_v38  ;;  %v923_v45 = vsel %vm781_vm2, %v777_v38, 0.0  ;;  %4376 = vmatprep.subr.mxu0 %v3720_v37  ;;  %v780_v50 = vadd.f32 %v772_v41, %v756_v46 }
 0x1d3   : > { %4365 = vmatmul.mubr.msk.f32.gmra.mxu0 %vm781_vm2, %v778_v40  ;;  %v1156_v48 = vpop.f32.mrf.mxu1 }
 0x1d4   : > { %v779_v49 = vadd.f32 %v771_v44, %v755_v43  ;;  %921 = vadd.xlane.f32.xlu1 %v920_v47  ;;  %924 = vadd.xlane.f32.xlu0 %v923_v45  ;;  %v932_v56 = vsel %vm781_vm2, %v780_v50, 0.0 }
 0x1d5   : > { %4377 = vmatpush3.msra.mxu0 %v3720_v37  ;;  %v4403_v51 = vpop.f32.mrf.mxu1 }
 0x1d6   : > { %4367 = vmatprep.mubr.msk.f32.mxu0 %vm781_vm2, %v779_v49  ;;  %v929_v52 = vsel %vm781_vm2, %v779_v49, 0.0  ;;  %4410 = vmatprep.subr.mxu0 %v3731_v60 }
 0x1d7   : > { %4368 = vmatmul.mubr.msk.f32.gmra.mxu0 %vm781_vm2, %v780_v50  ;;  %v1166_v54 = vpop.f32.mrf.mxu1 }
 0x1d8   : > { %927 = vadd.xlane.f32.xlu1 %v926_v53  ;;  %930 = vadd.xlane.f32.xlu0 %v929_v52 }
 0x1d9   : > { %4378 = vmatprep.mubr.msk.f32.mxu0 %vm247_vm0, %v4940_v7  ;;  %v4406_v55 = vpop.f32.mrf.mxu1 }
 0x1db   : > { %4379 = vmatmul.mubr.msk.f32.vlgmr.msra.gmra.mxu0 %vm247_vm0, %v4943_v8  ;;  %v1176_v57 = vpop.f32.mrf.mxu1 }
 0x1dc   : > { %933 = vadd.xlane.f32.xlu1 %v932_v56  ;;  %4381 = vmatprep.mubr.msk.f32.mxu0 %vm247_vm0, %v4951_v10 }
 0x1dd   : > { %v4409_v58 = vpop.f32.mrf.mxu1  ;;  %4411 = vmatpush3.msra.mxu0 %v3731_v60 }
 0x1de   : > { %4430 = vmatprep.subr.msk.mxu1 %vm595_vm1, %v4409_v58  ;;  %4412 = vmatprep.subr.mxu0 %v3730_v61 }
 0x1df   : > { %4382 = vmatmul.mubr.msk.f32.gmra.mxu0 %vm247_vm0, %v4961_v12  ;;  %4431 = vmatpush3.xpose.msk.msra.mxu1 %vm595_vm1, %v4409_v58  ;;  %v1186_v59 = vpop.f32.mrf.mxu1 }
 0x1e0   : > { %4384 = vmatprep.mubr.msk.f32.mxu0 %vm247_vm0, %v4964_v13  ;;  %4432 = vmatprep.subr.msk.mxu1 %vm595_vm1, %v1186_v59 }
 0x1e1   : > { %4413 = vmatpush3.msra.mxu0 %v3730_v61 }
 0x1e2   : > { %4414 = vmatprep.subr.mxu0 %v3729_v62 }
 0x1e3   : > { %4385 = vmatmul.mubr.msk.f32.gmra.mxu0 %vm247_vm0, %v4980_v15  ;;  %4433 = vmatpush3.xpose.msk.msra.mxu1 %vm595_vm1, %v1186_v59 }
 0x1e4   : > { %4387 = vmatprep.mubr.msk.f32.mxu0 %vm247_vm0, %v4983_v16  ;;  %4434 = vmatprep.subr.msk.mxu1 %vm595_vm1, %v4406_v55 }
 0x1e5   : > { %4415 = vmatpush3.msra.mxu0 %v3729_v62 }
 0x1e6   : > { %4416 = vmatprep.subr.mxu0 %v3728_v63 }
 0x1e7   : > { %4388 = vmatmul.mubr.msk.f32.gmra.mxu0 %vm247_vm0, %v4997_v18  ;;  %4435 = vmatpush3.xpose.msk.msra.mxu1 %vm595_vm1, %v4406_v55 }
 0x1e8   : > { %4436 = vmatprep.subr.msk.mxu1 %vm595_vm1, %v1176_v57  ;;  %4418 = vmatprep.mubr.msk.f32.mxu0 %vm247_vm0, %v4940_v7 }
 0x1e9   : > { %4417 = vmatpush3.msra.mxu0 %v3728_v63 }
 0x1eb   : > { %4437 = vmatpush3.xpose.msk.msra.mxu1 %vm595_vm1, %v1176_v57  ;;  %4419 = vmatmul.mubr.msk.f32.vlgmr.msra.gmra.mxu0 %vm247_vm0, %v4943_v8 }
 0x1ec   : > { %4438 = vmatprep.subr.msk.mxu1 %vm595_vm1, %v4403_v51  ;;  %4421 = vmatprep.mubr.msk.f32.mxu0 %vm247_vm0, %v4951_v10 }
 0x1ef   : > { %4439 = vmatpush3.xpose.msk.msra.mxu1 %vm595_vm1, %v4403_v51  ;;  %4422 = vmatmul.mubr.msk.f32.gmra.mxu0 %vm247_vm0, %v4961_v12 }
 0x1f0   : > { %4440 = vmatprep.subr.msk.mxu1 %vm595_vm1, %v1166_v54  ;;  %4424 = vmatprep.mubr.msk.f32.mxu0 %vm247_vm0, %v4964_v13 }
 0x1f3   : > { %4441 = vmatpush3.xpose.msk.msra.mxu1 %vm595_vm1, %v1166_v54  ;;  %4425 = vmatmul.mubr.msk.f32.gmra.mxu0 %vm247_vm0, %v4980_v15 }
 0x1f4   : > { %4442 = vmatprep.subr.msk.mxu1 %vm595_vm1, %v5103_v42  ;;  %4427 = vmatprep.mubr.msk.f32.mxu0 %vm247_vm0, %v4983_v16 }
 0x1f7   : > { %4443 = vmatpush3.xpose.msk.msra.mxu1 %vm595_vm1, %v5103_v42  ;;  %4428 = vmatmul.mubr.msk.f32.gmra.mxu0 %vm247_vm0, %v4997_v18 }
 0x1f8   : > { %4444 = vmatprep.subr.msk.mxu1 %vm595_vm1, %v1156_v48 }
 0x1fb   : > { %4445 = vmatpush3.xpose.msk.msra.mxu1 %vm595_vm1, %v1156_v48 }
 0x1fc   : > { %4502 = vmatprep.subr.mxu1 %v246_v0 }
 0x254   : > { %v913_v4 = vpop.xlane.xlu0 %912 }
 0x255   : > { %v935_v20 = vmax.f32 %v913_v4, 1e-05 }
 0x257   : > { %4790 = vrcp.f32 %v935_v20  ;;  %v3802_v20 = vld [vmem:[%s5640_s2 + $0x40] sm:$0xff] }
 0x259   : > { %v919_v9 = vpop.xlane.xlu1 %918  ;;  %v916_v14 = vpop.xlane.xlu0 %915 }
 0x25a   : > { %v936_v23 = vmax.f32 %v916_v14, 1e-05  ;;  %v937_v26 = vmax.f32 %v919_v9, 1e-05 }
 0x25c   : > { %4792 = vrcp.f32 %v936_v23 }
 0x25d   : > { %v922_v21 = vpop.xlane.xlu1 %921  ;;  %v925_v24 = vpop.xlane.xlu0 %924  ;;  %4794 = vrcp.f32 %v937_v26 }
 0x25e   : > { %v938_v32 = vmax.f32 %v922_v21, 1e-05  ;;  %v939_v34 = vmax.f32 %v925_v24, 1e-05 }
 0x260   : > { %4796 = vrcp.f32 %v938_v32 }
 0x261   : > { %v928_v30 = vpop.xlane.xlu1 %927  ;;  %v931_v36 = vpop.xlane.xlu0 %930  ;;  %4798 = vrcp.f32 %v939_v34 }
 0x262   : > { %v940_v39 = vmax.f32 %v928_v30, 1e-05  ;;  %v941_v41 = vmax.f32 %v931_v36, 1e-05 }
 0x264   : > { %4800 = vrcp.f32 %v940_v39  ;;  %v4791_v49 = vpop.eup %4790 }
 0x265   : > { %v934_v42 = vpop.xlane.xlu1 %933  ;;  %4802 = vrcp.f32 %v941_v41 }
 0x266   : > { %v942_v46 = vmax.f32 %v934_v42, 1e-05 }
 0x268   : > { %4804 = vrcp.f32 %v942_v46 }
 0x269   : > { %v4793_v52 = vpop.eup %4792 }
 0x26a   : > { %v4795_v53 = vpop.eup %4794 }
 0x26d   : > { %v4797_v57 = vpop.eup %4796 }
 0x26e   : > { %v4799_v58 = vpop.eup %4798 }
 0x271   : > { %v4801_v63 = vpop.eup %4800 }
 0x28b   : > { %v5179_v1 = vpop.f32.mrf.mxu0 }
 0x28c   : > { %v952_v54 = vmul.f32 %v4793_v52, %v5179_v1 }
 0x28d   : > { %v872_v2 = vpop.f32.mrf.mxu0 }
 0x28e   : > { %v951_v51 = vmul.f32 %v4791_v49, %v872_v2 }
 0x28f   : > { %v5181_v3 = vpop.f32.mrf.mxu0 }
 0x290   : > { %v954_v59 = vmul.f32 %v4797_v57, %v5181_v3 }
 0x291   : > { %v882_v5 = vpop.f32.mrf.mxu0 }
 0x292   : > { %v953_v55 = vmul.f32 %v4795_v53, %v882_v5 }
 0x293   : > { %v5183_v6 = vpop.f32.mrf.mxu0 }
 0x294   : > { %v956_v1 = vmul.f32 %v4801_v63, %v5183_v6  ;;  %v3732_v63 = vld [vmem:[%s5642_s4 + $0x10] sm:$0xff] }
 0x295   : > { %v5185_v11 = vpop.f32.mrf.mxu0 }
 0x296   : > { %v955_v61 = vmul.f32 %v4799_v58, %v5185_v11 }
 0x297   : > { %v5187_v17 = vpop.f32.mrf.mxu0 }
 0x299   : > { %v5189_v19 = vpop.f32.mrf.mxu0 }
 0x29b   : > { %v4380_v22 = vpop.f32.mrf.mxu0 }
 0x29c   : > { %v1083_v28 = vmul.f32 0.25, %v4380_v22 }
 0x29d   : > { %v1043_v25 = vpop.f32.mrf.mxu0 }
 0x29e   : > { %v1082_v27 = vmul.f32 0.25, %v1043_v25 }
 0x29f   : > { %v4383_v29 = vpop.f32.mrf.mxu0 }
 0x2a0   : > { %4446 = vmatprep.mubr.msk.f32.mxu1 %vm595_vm1, %v1082_v27  ;;  %v1085_v37 = vmul.f32 0.25, %v4383_v29 }
 0x2a1   : > { %v1053_v33 = vpop.f32.mrf.mxu0  ;;  %4447 = vmatmul.mubr.msk.f32.vlgmr.msra.gmra.mxu1 %vm595_vm1, %v1083_v28 }
 0x2a2   : > { %v1084_v35 = vmul.f32 0.25, %v1053_v33  ;;  %4503 = vmatpush3.msra.mxu1 %v246_v0  ;;  %v4803_v0 = vpop.eup %4802 }
 0x2a3   : > { %v4386_v38 = vpop.f32.mrf.mxu0  ;;  %4504 = vmatprep.subr.mxu1 %v245_v31  ;;  %v957_v4 = vmul.f32 %v4803_v0, %v5189_v19  ;;  %v4805_v9 = vpop.eup %4804  ;;  %v3803_v19 = vld [vmem:[%s5640_s2 + $0x48] sm:$0xff] }
 0x2a4   : > { %4449 = vmatprep.mubr.msk.f32.mxu1 %vm595_vm1, %v1084_v35  ;;  %4505 = vmatpush3.msra.mxu1 %v245_v31  ;;  %v1087_v44 = vmul.f32 0.25, %v4386_v38  ;;  %v958_v3 = vmul.f32 %v4805_v9, %v5187_v17  ;;  %v3804_v17 = vld [vmem:[%s5640_s2 + $0x50] sm:$0xff] }
 0x2a5   : > { %v1063_v40 = vpop.f32.mrf.mxu0  ;;  %4450 = vmatmul.mubr.msk.f32.gmra.mxu1 %vm595_vm1, %v1085_v37 }
 0x2a6   : > { %v1086_v43 = vmul.f32 0.25, %v1063_v40 }
 0x2a7   : > { %v4389_v45 = vpop.f32.mrf.mxu0 }
 0x2a8   : > { %4452 = vmatprep.mubr.msk.f32.mxu1 %vm595_vm1, %v1086_v43  ;;  %v1089_v50 = vmul.f32 0.25, %v4389_v45 }
 0x2a9   : > { %v1073_v47 = vpop.f32.mrf.mxu0  ;;  %4453 = vmatmul.mubr.msk.f32.gmra.mxu1 %vm595_vm1, %v1087_v44 }
 0x2aa   : > { %v1088_v48 = vmul.f32 0.25, %v1073_v47 }
 0x2ab   : > { %v4420_v56 = vpop.f32.mrf.mxu0 }
 0x2ac   : > { %4455 = vmatprep.mubr.msk.f32.mxu1 %vm595_vm1, %v1088_v48 }
 0x2ad   : > { %4456 = vmatmul.mubr.msk.f32.gmra.mxu1 %vm595_vm1, %v1089_v50  ;;  %v1261_v60 = vpop.f32.mrf.mxu0 }
 0x2ae   : > { %4506 = vmatprep.mubr.msk.f32.mxu1 %vm595_vm1, %v951_v51 }
 0x2af   : > { %v4423_v62 = vpop.f32.mrf.mxu0 }
 0x2b1   : > { %4507 = vmatmul.mubr.msk.f32.vlgmr.msra.gmra.mxu1 %vm595_vm1, %v952_v54  ;;  %v1271_v2 = vpop.f32.mrf.mxu0 }
 0x2b2   : > { %4509 = vmatprep.mubr.msk.f32.mxu1 %vm595_vm1, %v953_v55 }
 0x2b3   : > { %v4426_v5 = vpop.f32.mrf.mxu0 }
 0x2b5   : > { %4510 = vmatmul.mubr.msk.f32.gmra.mxu1 %vm595_vm1, %v954_v59  ;;  %v1281_v11 = vpop.f32.mrf.mxu0 }
 0x2b6   : > { %4512 = vmatprep.mubr.msk.f32.mxu1 %vm595_vm1, %v955_v61 }
 0x2b7   : > { %v4429_v14 = vpop.f32.mrf.mxu0 }
 0x2b8   : > { %4458 = vmatprep.subr.mxu0 %v4429_v14 }
 0x2b9   : > { %4513 = vmatmul.mubr.msk.f32.gmra.mxu1 %vm595_vm1, %v956_v1  ;;  %v1291_v6 = vpop.f32.mrf.mxu0  ;;  %4459 = vmatpush3.msra.mxu0 %v4429_v14  ;;  %v5271_v1 = vld [vmem:[%s5639_s1 + $0x58] sm:$0xff] }
 0x2ba   : > { %4515 = vmatprep.mubr.msk.f32.mxu1 %vm595_vm1, %v957_v4  ;;  %4460 = vmatprep.subr.mxu0 %v1291_v6 }
 0x2bb   : > { %4461 = vmatpush3.msra.mxu0 %v1291_v6 }
 0x2bc   : > { %4462 = vmatprep.subr.mxu0 %v4426_v5 }
 0x2bd   : > { %4516 = vmatmul.mubr.msk.f32.gmra.mxu1 %vm595_vm1, %v958_v3  ;;  %4463 = vmatpush3.msra.mxu0 %v4426_v5 }
 0x2be   : > { %4546 = vmatprep.mubr.msk.f32.mxu1 %vm247_vm0, %v4940_v7  ;;  %4464 = vmatprep.subr.mxu0 %v1281_v11  ;;  %v3805_v7 = vld [vmem:[%s5640_s2 + $0x58] sm:$0xff] }
 0x2bf   : > { %4465 = vmatpush3.msra.mxu0 %v1281_v11  ;;  %4538 = vmatprep.subr.mxu1 %v3805_v7 }
 0x2c0   : > { %4466 = vmatprep.subr.mxu0 %v4423_v62  ;;  %4539 = vmatpush3.msra.mxu1 %v3805_v7 }
 0x2c1   : > { %4467 = vmatpush3.msra.mxu0 %v4423_v62  ;;  %4540 = vmatprep.subr.mxu1 %v3804_v17  ;;  %v3733_v62 = vld [vmem:[%s5642_s4 + $0x18] sm:$0xff] }
 0x2c2   : > { %4468 = vmatprep.subr.mxu0 %v1271_v2  ;;  %4541 = vmatpush3.msra.mxu1 %v3804_v17 }
 0x2c3   : > { %4469 = vmatpush3.msra.mxu0 %v1271_v2  ;;  %4542 = vmatprep.subr.mxu1 %v3803_v19 }
 0x2c4   : > { %4470 = vmatprep.subr.mxu0 %v4420_v56  ;;  %4543 = vmatpush3.msra.mxu1 %v3803_v19 }
 0x2c5   : > { %4471 = vmatpush3.msra.mxu0 %v4420_v56  ;;  %4544 = vmatprep.subr.mxu1 %v3802_v20 }
 0x2c6   : > { %4472 = vmatprep.subr.mxu0 %v1261_v60  ;;  %4545 = vmatpush3.msra.mxu1 %v3802_v20 }
 0x2c7   : > { %4473 = vmatpush3.msra.mxu0 %v1261_v60  ;;  %4547 = vmatmul.mubr.msk.f32.vlgmr.msra.gmra.mxu1 %vm247_vm0, %v4943_v8 }
 0x2c8   : > { %4549 = vmatprep.mubr.msk.f32.mxu1 %vm247_vm0, %v4951_v10  ;;  %4486 = vmatprep.subr.mxu0 %v3733_v62 }
 0x2cb   : > { %4550 = vmatmul.mubr.msk.f32.gmra.mxu1 %vm247_vm0, %v4961_v12 }
 0x2cc   : > { %4552 = vmatprep.mubr.msk.f32.mxu1 %vm247_vm0, %v4964_v13 }
 0x2cf   : > { %4553 = vmatmul.mubr.msk.f32.gmra.mxu1 %vm247_vm0, %v4980_v15 }
 0x2d0   : > { %4555 = vmatprep.mubr.msk.f32.mxu1 %vm247_vm0, %v4983_v16 }
 0x2d3   : > { %4556 = vmatmul.mubr.msk.f32.gmra.mxu1 %vm247_vm0, %v4997_v18 }
 0x361   : > { %v4448_v21 = vpop.f32.mrf.mxu1 }
 0x362   : > { %v1462_v8 = vmul.f32 0.5, %v4448_v21  ;;  %v1454_v23 = vadd.f32 1.0, %v4448_v21 }
 0x363   : > { %v1414_v22 = vpop.f32.mrf.mxu1 }
 0x364   : > { %v1470_v10 = vmul.f32 %v4448_v21, %v1462_v8  ;;  %v1461_v24 = vmul.f32 0.5, %v1414_v22  ;;  %v1453_v12 = vadd.f32 1.0, %v1414_v22 }
 0x365   : > { %v4451_v25 = vpop.f32.mrf.mxu1 }
 0x366   : > { %v1469_v26 = vmul.f32 %v1461_v24, %v1414_v22  ;;  %v1464_v27 = vmul.f32 0.5, %v4451_v25  ;;  %v1478_v13 = vadd.f32 %v1470_v10, %v1454_v23  ;;  %v1456_v31 = vadd.f32 1.0, %v4451_v25 }
 0x367   : > { %v1424_v28 = vpop.f32.mrf.mxu1 }
 0x368   : > { %v1477_v29 = vadd.f32 %v1469_v26, %v1453_v12  ;;  %v1472_v15 = vmul.f32 %v4451_v25, %v1464_v27  ;;  %v1463_v30 = vmul.f32 0.5, %v1424_v28  ;;  %v1617_v16 = vsel %vm781_vm2, %v1478_v13, 0.0 }
 0x369   : > { %v4454_v32 = vpop.f32.mrf.mxu1  ;;  %v1455_v18 = vadd.f32 1.0, %v1424_v28  ;;  %1618 = vadd.xlane.f32.xlu1 %v1617_v16 }
 0x36a   : > { %v1471_v33 = vmul.f32 %v1463_v30, %v1424_v28  ;;  %v1466_v34 = vmul.f32 0.5, %v4454_v32  ;;  %4474 = vmatprep.mubr.msk.f32.mxu0 %vm781_vm2, %v1477_v29  ;;  %v1614_v35 = vsel %vm781_vm2, %v1477_v29, 0.0  ;;  %v1480_v37 = vadd.f32 %v1472_v15, %v1456_v31 }
 0x36b   : > { %1615 = vadd.xlane.f32.xlu0 %v1614_v35  ;;  %v1434_v36 = vpop.f32.mrf.mxu1  ;;  %4475 = vmatmul.mubr.msk.f32.vlgmr.msra.gmra.mxu0 %vm781_vm2, %v1478_v13  ;;  %v1458_v41 = vadd.f32 1.0, %v4454_v32 }
 0x36c   : > { %v1479_v38 = vadd.f32 %v1471_v33, %v1455_v18  ;;  %v1474_v39 = vmul.f32 %v4454_v32, %v1466_v34  ;;  %v1465_v40 = vmul.f32 0.5, %v1434_v36  ;;  %v1623_v42 = vsel %vm781_vm2, %v1480_v37, 0.0  ;;  %4487 = vmatpush3.msra.mxu0 %v3733_v62  ;;  %v3808_v62 = vld [vmem:[%s5641_s3 + $0x50] sm:$0xff] }
 0x36d   : > { %v4457_v43 = vpop.f32.mrf.mxu1  ;;  %v1457_v44 = vadd.f32 1.0, %v1434_v36  ;;  %1624 = vadd.xlane.f32.xlu1 %v1623_v42  ;;  %4488 = vmatprep.subr.mxu0 %v3732_v63 }
 0x36e   : > { %v1473_v45 = vmul.f32 %v1465_v40, %v1434_v36  ;;  %v1468_v46 = vmul.f32 0.5, %v4457_v43  ;;  %4477 = vmatprep.mubr.msk.f32.mxu0 %vm781_vm2, %v1479_v38  ;;  %v1620_v47 = vsel %vm781_vm2, %v1479_v38, 0.0  ;;  %v1482_v49 = vadd.f32 %v1474_v39, %v1458_v41  ;;  %4489 = vmatpush3.msra.mxu0 %v3732_v63  ;;  %v3800_v40 = vld [vmem:[%s5639_s1 + $0x50] sm:$0xff]  ;;  %v5334_v63 = vld [vmem:[%s4937_s12 + $0x8] sm:$0xff] }
 0x36f   : > { %1621 = vadd.xlane.f32.xlu0 %v1620_v47  ;;  %v1444_v48 = vpop.f32.mrf.mxu1  ;;  %4478 = vmatmul.mubr.msk.f32.gmra.mxu0 %vm781_vm2, %v1480_v37  ;;  %v1460_v51 = vadd.f32 1.0, %v4457_v43 }
 0x370   : > { %v1481_v50 = vadd.f32 %v1473_v45, %v1457_v44  ;;  %v1476_v52 = vmul.f32 %v4457_v43, %v1468_v46  ;;  %v1467_v53 = vmul.f32 0.5, %v1444_v48  ;;  %v1629_v54 = vsel %vm781_vm2, %v1482_v49, 0.0  ;;  %4518 = vmatprep.subr.mxu0 %v5271_v1  ;;  %v3799_v45 = vld [vmem:[%s5639_s1 + $0x48] sm:$0xff] }
 0x371   : > { %v1459_v55 = vadd.f32 1.0, %v1444_v48  ;;  %1630 = vadd.xlane.f32.xlu1 %v1629_v54  ;;  %v5266_v0 = vpop.f32.mrf.mxu1 }
 0x372   : > { %v1475_v56 = vmul.f32 %v1467_v53, %v1444_v48  ;;  %4480 = vmatprep.mubr.msk.f32.mxu0 %vm781_vm2, %v1481_v50  ;;  %v1626_v57 = vsel %vm781_vm2, %v1481_v50, 0.0  ;;  %v1484_v58 = vadd.f32 %v1476_v52, %v1460_v51  ;;  %v3798_v48 = vld [vmem:[%s5639_s1 + $0x40] sm:$0xff]  ;;  %v3809_v53 = vld [vmem:[%s5641_s3 + $0x58] sm:$0xff] }
 0x373   : > { %1627 = vadd.xlane.f32.xlu0 %v1626_v57  ;;  %4481 = vmatmul.mubr.msk.f32.gmra.mxu0 %vm781_vm2, %v1482_v49  ;;  %v5274_v2 = vpop.f32.mrf.mxu1 }
 0x374   : > { %v1483_v59 = vadd.f32 %v1475_v56, %v1459_v55  ;;  %v1635_v60 = vsel %vm781_vm2, %v1484_v58, 0.0 }
 0x375   : > { %1636 = vadd.xlane.f32.xlu1 %v1635_v60  ;;  %v5276_v4 = vpop.f32.mrf.mxu1 }
 0x376   : > { %4483 = vmatprep.mubr.msk.f32.mxu0 %vm781_vm2, %v1483_v59  ;;  %v1632_v61 = vsel %vm781_vm2, %v1483_v59, 0.0 }
 0x377   : > { %1633 = vadd.xlane.f32.xlu0 %v1632_v61  ;;  %4484 = vmatmul.mubr.msk.f32.gmra.mxu0 %vm781_vm2, %v1484_v58  ;;  %v5278_v5 = vpop.f32.mrf.mxu1  ;;  %v5326_v61 = vld [vmem:[%s4937_s12] sm:$0xff] }
 0x379   : > { %v5280_v9 = vpop.f32.mrf.mxu1 }
 0x37b   : > { %v5282_v3 = vpop.f32.mrf.mxu1 }
 0x37d   : > { %v5284_v11 = vpop.f32.mrf.mxu1 }
 0x37f   : > { %v5286_v14 = vpop.f32.mrf.mxu1 }
 0x387   : > { %v4548_v6 = vpop.f32.mrf.mxu1 }
 0x389   : > { %v2117_v7 = vpop.f32.mrf.mxu1 }
 0x38b   : > { %v4551_v17 = vpop.f32.mrf.mxu1 }
 0x38d   : > { %v2127_v19 = vpop.f32.mrf.mxu1 }
 0x38f   : > { %v4554_v20 = vpop.f32.mrf.mxu1 }
 0x391   : > { %v2137_v21 = vpop.f32.mrf.mxu1 }
 0x393   : > { %v4557_v8 = vpop.f32.mrf.mxu1 }
 0x394   : > { %4578 = vmatprep.subr.msk.mxu1 %vm595_vm1, %v4557_v8 }
 0x395   : > { %4579 = vmatpush3.xpose.msk.msra.mxu1 %vm595_vm1, %v4557_v8  ;;  %v2147_v22 = vpop.f32.mrf.mxu1  ;;  %v5370_v8 = vld [vmem:[%s4937_s12 + $0x38] sm:$0xff] }
 0x396   : > { %4580 = vmatprep.subr.msk.mxu1 %vm595_vm1, %v2147_v22 }
 0x399   : > { %4581 = vmatpush3.xpose.msk.msra.mxu1 %vm595_vm1, %v2147_v22 }
 0x39a   : > { %4582 = vmatprep.subr.msk.mxu1 %vm595_vm1, %v4554_v20 }
 0x39d   : > { %4583 = vmatpush3.xpose.msk.msra.mxu1 %vm595_vm1, %v4554_v20  ;;  %v5360_v20 = vld [vmem:[%s4937_s12 + $0x28] sm:$0xff] }
 0x39e   : > { %4584 = vmatprep.subr.msk.mxu1 %vm595_vm1, %v2137_v21 }
 0x3a1   : > { %4585 = vmatpush3.xpose.msk.msra.mxu1 %vm595_vm1, %v2137_v21  ;;  %v5365_v21 = vld [vmem:[%s4937_s12 + $0x30] sm:$0xff] }
 0x3a2   : > { %4586 = vmatprep.subr.msk.mxu1 %vm595_vm1, %v4551_v17 }
 0x3a5   : > { %4587 = vmatpush3.xpose.msk.msra.mxu1 %vm595_vm1, %v4551_v17  ;;  %v5350_v17 = vld [vmem:[%s4937_s12 + $0x18] sm:$0xff] }
 0x3a6   : > { %4588 = vmatprep.subr.msk.mxu1 %vm595_vm1, %v2127_v19 }
 0x3a9   : > { %4589 = vmatpush3.xpose.msk.msra.mxu1 %vm595_vm1, %v2127_v19  ;;  %v5355_v19 = vld [vmem:[%s4937_s12 + $0x20] sm:$0xff] }
 0x3aa   : > { %4590 = vmatprep.subr.msk.mxu1 %vm595_vm1, %v4548_v6 }
 0x3ad   : > { %4591 = vmatpush3.xpose.msk.msra.mxu1 %vm595_vm1, %v4548_v6  ;;  %v3807_v6 = vld [vmem:[%s5641_s3 + $0x48] sm:$0xff] }
 0x3ae   : > { %4592 = vmatprep.subr.msk.mxu1 %vm595_vm1, %v2117_v7 }
 0x3b1   : > { %4593 = vmatpush3.xpose.msk.msra.mxu1 %vm595_vm1, %v2117_v7  ;;  %v3806_v7 = vld [vmem:[%s5641_s3 + $0x40] sm:$0xff] }
 0x3f2   : > { %v1619_v10 = vpop.xlane.xlu1 %1618 }
 0x3f3   : > { %v1639_v26 = vmax.f32 %v1619_v10, 1e-05 }
 0x3f4   : > { %v1616_v23 = vpop.xlane.xlu0 %1615 }
 0x3f5   : > { %v1638_v12 = vmax.f32 %v1616_v23, 1e-05 }
 0x3f6   : > { %v1625_v25 = vpop.xlane.xlu1 %1624 }
 0x3f7   : > { %4806 = vrcp.f32 %v1638_v12  ;;  %v1641_v29 = vmax.f32 %v1625_v25, 1e-05 }
 0x3f8   : > { %v1622_v24 = vpop.xlane.xlu0 %1621  ;;  %4808 = vrcp.f32 %v1639_v26 }
 0x3f9   : > { %v1640_v13 = vmax.f32 %v1622_v24, 1e-05 }
 0x3fa   : > { %v1631_v28 = vpop.xlane.xlu1 %1630 }
 0x3fb   : > { %4810 = vrcp.f32 %v1640_v13  ;;  %v1643_v30 = vmax.f32 %v1631_v28, 1e-05 }
 0x3fc   : > { %v1628_v27 = vpop.xlane.xlu0 %1627  ;;  %4812 = vrcp.f32 %v1641_v29 }
 0x3fd   : > { %v1642_v15 = vmax.f32 %v1628_v27, 1e-05 }
 0x3fe   : > { %v1637_v16 = vpop.xlane.xlu1 %1636 }
 0x3ff   : > { %4814 = vrcp.f32 %v1642_v15  ;;  %v1645_v18 = vmax.f32 %v1637_v16, 1e-05 }
 0x400   : > { %v1634_v31 = vpop.xlane.xlu0 %1633  ;;  %4816 = vrcp.f32 %v1643_v30 }
 0x401   : > { %v1644_v32 = vmax.f32 %v1634_v31, 1e-05 }
 0x403   : > { %4818 = vrcp.f32 %v1644_v32 }
 0x404   : > { %v4807_v34 = vpop.eup %4806  ;;  %4820 = vrcp.f32 %v1645_v18 }
 0x405   : > { %v4809_v36 = vpop.eup %4808 }
 0x408   : > { %v4811_v41 = vpop.eup %4810 }
 0x409   : > { %v4813_v43 = vpop.eup %4812 }
 0x40c   : > { %v4815_v49 = vpop.eup %4814 }
 0x40d   : > { %v4817_v51 = vpop.eup %4816 }
 0x410   : > { %v4819_v56 = vpop.eup %4818 }
 0x411   : > { %v4821_v58 = vpop.eup %4820 }
 0x42b   : > { %v4476_v33 = vpop.f32.mrf.mxu0 }
 0x42c   : > { %v1655_v38 = vmul.f32 %v4809_v36, %v4476_v33 }
 0x42d   : > { %v1575_v35 = vpop.f32.mrf.mxu0 }
 0x42e   : > { %v1654_v37 = vmul.f32 %v4807_v34, %v1575_v35 }
 0x42f   : > { %v4479_v39 = vpop.f32.mrf.mxu0 }
 0x430   : > { %4490 = vmatprep.mubr.msk.f32.mxu0 %vm595_vm1, %v1654_v37  ;;  %v1657_v46 = vmul.f32 %v4813_v43, %v4479_v39 }
 0x431   : > { %v1585_v42 = vpop.f32.mrf.mxu0  ;;  %4491 = vmatmul.mubr.msk.f32.vlgmr.msra.gmra.mxu0 %vm595_vm1, %v1655_v38 }
 0x432   : > { %v1656_v44 = vmul.f32 %v4811_v41, %v1585_v42  ;;  %4519 = vmatpush3.msra.mxu0 %v5271_v1  ;;  %v5339_v1 = vld [vmem:[%s4937_s12 + $0x10] sm:$0xff] }
 0x433   : > { %v4482_v47 = vpop.f32.mrf.mxu0  ;;  %4520 = vmatprep.subr.mxu0 %v3800_v40 }
 0x434   : > { %4493 = vmatprep.mubr.msk.f32.mxu0 %vm595_vm1, %v1656_v44  ;;  %4521 = vmatpush3.msra.mxu0 %v3800_v40  ;;  %v1659_v54 = vmul.f32 %v4817_v51, %v4482_v47 }
 0x435   : > { %v1595_v50 = vpop.f32.mrf.mxu0  ;;  %4494 = vmatmul.mubr.msk.f32.gmra.mxu0 %vm595_vm1, %v1657_v46  ;;  %4522 = vmatprep.subr.mxu0 %v3799_v45 }
 0x436   : > { %v1658_v52 = vmul.f32 %v4815_v49, %v1595_v50  ;;  %4523 = vmatpush3.msra.mxu0 %v3799_v45 }
 0x437   : > { %v4485_v55 = vpop.f32.mrf.mxu0  ;;  %4524 = vmatprep.subr.mxu0 %v3798_v48 }
 0x438   : > { %4496 = vmatprep.mubr.msk.f32.mxu0 %vm595_vm1, %v1658_v52  ;;  %4525 = vmatpush3.msra.mxu0 %v3798_v48  ;;  %v1661_v60 = vmul.f32 %v4821_v58, %v4485_v55 }
 0x439   : > { %v1605_v57 = vpop.f32.mrf.mxu0  ;;  %4497 = vmatmul.mubr.msk.f32.gmra.mxu0 %vm595_vm1, %v1659_v54  ;;  %4558 = vmatprep.subr.mxu0 %v3809_v53 }
 0x43a   : > { %v1660_v59 = vmul.f32 %v4819_v56, %v1605_v57 }
 0x43c   : > { %4499 = vmatprep.mubr.msk.f32.mxu0 %vm595_vm1, %v1660_v59 }
 0x43d   : > { %4500 = vmatmul.mubr.msk.f32.gmra.mxu0 %vm595_vm1, %v1661_v60 }
 0x43e   : > { %4526 = vmatprep.mubr.msk.f32.mxu0 %vm247_vm0, %v5326_v61 }
 0x441   : > { %4527 = vmatmul.mubr.msk.f32.vlgmr.msra.gmra.mxu0 %vm247_vm0, %v5334_v63 }
 0x442   : > { %4529 = vmatprep.mubr.msk.f32.mxu0 %vm247_vm0, %v5339_v1  ;;  %4559 = vmatpush3.msra.mxu0 %v3809_v53 }
 0x443   : > { %4560 = vmatprep.subr.mxu0 %v3808_v62 }
 0x444   : > { %4561 = vmatpush3.msra.mxu0 %v3808_v62 }
 0x445   : > { %4530 = vmatmul.mubr.msk.f32.gmra.mxu0 %vm247_vm0, %v5350_v17  ;;  %4562 = vmatprep.subr.mxu0 %v3807_v6 }
 0x446   : > { %4532 = vmatprep.mubr.msk.f32.mxu0 %vm247_vm0, %v5355_v19  ;;  %4563 = vmatpush3.msra.mxu0 %v3807_v6 }
 0x447   : > { %4564 = vmatprep.subr.mxu0 %v3806_v7 }
 0x448   : > { %4565 = vmatpush3.msra.mxu0 %v3806_v7 }
 0x449   : > { %4533 = vmatmul.mubr.msk.f32.gmra.mxu0 %vm247_vm0, %v5360_v20 }
 0x44a   : > { %4535 = vmatprep.mubr.msk.f32.mxu0 %vm247_vm0, %v5365_v21 }
 0x44d   : > { %4536 = vmatmul.mubr.msk.f32.gmra.mxu0 %vm247_vm0, %v5370_v8 }
 0x44e   : > { %4566 = vmatprep.mubr.msk.f32.mxu0 %vm247_vm0, %v5326_v61 }
 0x451   : > { %4567 = vmatmul.mubr.msk.f32.vlgmr.msra.gmra.mxu0 %vm247_vm0, %v5334_v63 }
 0x452   : > { %4569 = vmatprep.mubr.msk.f32.mxu0 %vm247_vm0, %v5339_v1 }
 0x455   : > { %4570 = vmatmul.mubr.msk.f32.gmra.mxu0 %vm247_vm0, %v5350_v17 }
 0x456   : > { %4572 = vmatprep.mubr.msk.f32.mxu0 %vm247_vm0, %v5355_v19 }
 0x459   : > { %4573 = vmatmul.mubr.msk.f32.gmra.mxu0 %vm247_vm0, %v5360_v20 }
 0x45a   : > { %4575 = vmatprep.mubr.msk.f32.mxu0 %vm247_vm0, %v5365_v21 }
 0x45d   : > { %4576 = vmatmul.mubr.msk.f32.gmra.mxu0 %vm247_vm0, %v5370_v8 }
 0x4f1   : > { %v5390_v22 = vpop.f32.mrf.mxu0 }
 0x4f3   : > { %v5392_v23 = vpop.f32.mrf.mxu0 }
 0x4f5   : > { %v5394_v10 = vpop.f32.mrf.mxu0 }
 0x4f7   : > { %v5396_v24 = vpop.f32.mrf.mxu0 }
 0x4f9   : > { %v5398_v25 = vpop.f32.mrf.mxu0 }
 0x4fb   : > { %v5400_v12 = vpop.f32.mrf.mxu0 }
 0x4fd   : > { %v5402_v26 = vpop.f32.mrf.mxu0 }
 0x4ff   : > { %v5404_v27 = vpop.f32.mrf.mxu0 }
 0x501   : > { %v4528_v13 = vpop.f32.mrf.mxu0 }
 0x502   : > { %v2044_v15 = vmul.f32 0.25, %v4528_v13 }
 0x503   : > { %v2004_v28 = vpop.f32.mrf.mxu0 }
 0x504   : > { %v2043_v29 = vmul.f32 0.25, %v2004_v28 }
 0x505   : > { %v4531_v30 = vpop.f32.mrf.mxu0 }
 0x506   : > { %4594 = vmatprep.mubr.msk.f32.mxu1 %vm595_vm1, %v2043_v29  ;;  %v2046_v32 = vmul.f32 0.25, %v4531_v30 }
 0x507   : > { %v2014_v31 = vpop.f32.mrf.mxu0  ;;  %4595 = vmatmul.mubr.msk.f32.vlgmr.msra.gmra.mxu1 %vm595_vm1, %v2044_v15 }
 0x508   : > { %v2045_v16 = vmul.f32 0.25, %v2014_v31 }
 0x509   : > { %v4534_v18 = vpop.f32.mrf.mxu0 }
 0x50a   : > { %4597 = vmatprep.mubr.msk.f32.mxu1 %vm595_vm1, %v2045_v16  ;;  %v2048_v35 = vmul.f32 0.25, %v4534_v18 }
 0x50b   : > { %v2024_v33 = vpop.f32.mrf.mxu0  ;;  %4598 = vmatmul.mubr.msk.f32.gmra.mxu1 %vm595_vm1, %v2046_v32 }
 0x50c   : > { %v2047_v34 = vmul.f32 0.25, %v2024_v33 }
 0x50d   : > { %v4537_v36 = vpop.f32.mrf.mxu0 }
 0x50e   : > { %4600 = vmatprep.mubr.msk.f32.mxu1 %vm595_vm1, %v2047_v34  ;;  %v2050_v39 = vmul.f32 0.25, %v4537_v36 }
 0x50f   : > { %v2034_v37 = vpop.f32.mrf.mxu0  ;;  %4601 = vmatmul.mubr.msk.f32.gmra.mxu1 %vm595_vm1, %v2048_v35 }
 0x510   : > { %v2049_v38 = vmul.f32 0.25, %v2034_v37 }
 0x511   : > { %v4568_v40 = vpop.f32.mrf.mxu0 }
 0x512   : > { %4603 = vmatprep.mubr.msk.f32.mxu1 %vm595_vm1, %v2049_v38 }
 0x513   : > { %4604 = vmatmul.mubr.msk.f32.gmra.mxu1 %vm595_vm1, %v2050_v39  ;;  %v2222_v41 = vpop.f32.mrf.mxu0 }
 0x514   : > { %4658 = vmatprep.mubr.msk.f32.mxu1 %vm247_vm0, %v5326_v61 }
 0x515   : > { %v4571_v42 = vpop.f32.mrf.mxu0 }
 0x517   : > { %v2232_v43 = vpop.f32.mrf.mxu0 }
 0x519   : > { %v4574_v44 = vpop.f32.mrf.mxu0 }
 0x51b   : > { %v2242_v45 = vpop.f32.mrf.mxu0 }
 0x51d   : > { %v4577_v46 = vpop.f32.mrf.mxu0 }
 0x51e   : > { %4606 = vmatprep.subr.mxu0 %v4577_v46 }
 0x51f   : > { %v2252_v47 = vpop.f32.mrf.mxu0  ;;  %4607 = vmatpush3.msra.mxu0 %v4577_v46 }
 0x520   : > { %4608 = vmatprep.subr.mxu0 %v2252_v47 }
 0x521   : > { %4609 = vmatpush3.msra.mxu0 %v2252_v47 }
 0x522   : > { %4610 = vmatprep.subr.mxu0 %v4574_v44 }
 0x523   : > { %4611 = vmatpush3.msra.mxu0 %v4574_v44 }
 0x524   : > { %4612 = vmatprep.subr.mxu0 %v2242_v45 }
 0x525   : > { %4613 = vmatpush3.msra.mxu0 %v2242_v45 }
 0x526   : > { %4614 = vmatprep.subr.mxu0 %v4571_v42 }
 0x527   : > { %4615 = vmatpush3.msra.mxu0 %v4571_v42 }
 0x528   : > { %4616 = vmatprep.subr.mxu0 %v2232_v43 }
 0x529   : > { %4617 = vmatpush3.msra.mxu0 %v2232_v43 }
 0x52a   : > { %4618 = vmatprep.subr.mxu0 %v4568_v40 }
 0x52b   : > { %4619 = vmatpush3.msra.mxu0 %v4568_v40 }
 0x52c   : > { %4620 = vmatprep.subr.mxu0 %v2222_v41 }
 0x52d   : > { %4621 = vmatpush3.msra.mxu0 %v2222_v41 }
 0x5c7   : > { %v4596_v48 = vpop.f32.mrf.mxu1 }
 0x5c8   : > { %v2423_v49 = vmul.f32 0.5, %v4596_v48  ;;  %v2415_v51 = vadd.f32 1.0, %v4596_v48 }
 0x5c9   : > { %v2375_v50 = vpop.f32.mrf.mxu1 }
 0x5ca   : > { %v2431_v52 = vmul.f32 %v4596_v48, %v2423_v49  ;;  %v2422_v53 = vmul.f32 0.5, %v2375_v50  ;;  %v2414_v55 = vadd.f32 1.0, %v2375_v50 }
 0x5cb   : > { %v4599_v54 = vpop.f32.mrf.mxu1 }
 0x5cc   : > { %v2430_v56 = vmul.f32 %v2422_v53, %v2375_v50  ;;  %v2425_v57 = vmul.f32 0.5, %v4599_v54  ;;  %v2439_v58 = vadd.f32 %v2431_v52, %v2415_v51  ;;  %v2417_v7 = vadd.f32 1.0, %v4599_v54 }
 0x5cd   : > { %v2385_v59 = vpop.f32.mrf.mxu1 }
 0x5ce   : > { %v2438_v60 = vadd.f32 %v2430_v56, %v2414_v55  ;;  %v2433_v62 = vmul.f32 %v4599_v54, %v2425_v57  ;;  %v2424_v6 = vmul.f32 0.5, %v2385_v59  ;;  %v2578_v13 = vsel %vm781_vm2, %v2439_v58, 0.0  ;;  %v3811_v56 = vld [vmem:[%s5642_s4 + $0x28] sm:$0xff]  ;;  %v3810_v57 = vld [vmem:[%s5642_s4 + $0x20] sm:$0xff] }
 0x5cf   : > { %v4602_v28 = vpop.f32.mrf.mxu1  ;;  %v2416_v29 = vadd.f32 1.0, %v2385_v59  ;;  %2579 = vadd.xlane.f32.xlu1 %v2578_v13  ;;  %4634 = vmatprep.subr.mxu0 %v3811_v56 }
 0x5d0   : > { %v2432_v15 = vmul.f32 %v2424_v6, %v2385_v59  ;;  %v2427_v30 = vmul.f32 0.5, %v4602_v28  ;;  %4622 = vmatprep.mubr.msk.f32.mxu0 %vm781_vm2, %v2438_v60  ;;  %v2575_v31 = vsel %vm781_vm2, %v2438_v60, 0.0  ;;  %v2441_v32 = vadd.f32 %v2433_v62, %v2417_v7  ;;  %v3871_v59 = vld [vmem:[%s5639_s1 + $0x78] sm:$0xff]  ;;  %v3870_v60 = vld [vmem:[%s5639_s1 + $0x70] sm:$0xff]  ;;  %v3869_v62 = vld [vmem:[%s5639_s1 + $0x68] sm:$0xff] }
 0x5d1   : > { %2576 = vadd.xlane.f32.xlu0 %v2575_v31  ;;  %v2395_v16 = vpop.f32.mrf.mxu1  ;;  %4623 = vmatmul.mubr.msk.f32.vlgmr.msra.gmra.mxu0 %vm781_vm2, %v2439_v58  ;;  %v2419_v35 = vadd.f32 1.0, %v4602_v28  ;;  %v3875_v58 = vld [vmem:[%s5640_s2 + $0x78] sm:$0xff]  ;;  %v3868_v6 = vld [vmem:[%s5639_s1 + $0x60] sm:$0xff] }
 0x5d2   : > { %v2440_v18 = vadd.f32 %v2432_v15, %v2416_v29  ;;  %v2435_v33 = vmul.f32 %v4602_v28, %v2427_v30  ;;  %v2426_v34 = vmul.f32 0.5, %v2395_v16  ;;  %v2584_v36 = vsel %vm781_vm2, %v2441_v32, 0.0  ;;  %4635 = vmatpush3.msra.mxu0 %v3811_v56  ;;  %4650 = vmatprep.subr.mxu1 %v3871_v59 }
 0x5d3   : > { %v4605_v37 = vpop.f32.mrf.mxu1  ;;  %v2418_v38 = vadd.f32 1.0, %v2395_v16  ;;  %2585 = vadd.xlane.f32.xlu1 %v2584_v36  ;;  %4636 = vmatprep.subr.mxu0 %v3810_v57 }
 0x5d4   : > { %v2434_v39 = vmul.f32 %v2426_v34, %v2395_v16  ;;  %v2429_v40 = vmul.f32 0.5, %v4605_v37  ;;  %4625 = vmatprep.mubr.msk.f32.mxu0 %vm781_vm2, %v2440_v18  ;;  %v2581_v41 = vsel %vm781_vm2, %v2440_v18, 0.0  ;;  %v2443_v43 = vadd.f32 %v2435_v33, %v2419_v35  ;;  %4637 = vmatpush3.msra.mxu0 %v3810_v57 }
 0x5d5   : > { %2582 = vadd.xlane.f32.xlu0 %v2581_v41  ;;  %v2405_v42 = vpop.f32.mrf.mxu1  ;;  %4626 = vmatmul.mubr.msk.f32.gmra.mxu0 %vm781_vm2, %v2441_v32  ;;  %v2421_v45 = vadd.f32 1.0, %v4605_v37 }
 0x5d6   : > { %v2442_v44 = vadd.f32 %v2434_v39, %v2418_v38  ;;  %v2437_v46 = vmul.f32 %v4605_v37, %v2429_v40  ;;  %v2428_v47 = vmul.f32 0.5, %v2405_v42  ;;  %v2590_v48 = vsel %vm781_vm2, %v2443_v43, 0.0  ;;  %4670 = vmatprep.subr.mxu0 %v3875_v58  ;;  %4651 = vmatpush3.msra.mxu1 %v3871_v59 }
 0x5d7   : > { %v2420_v49 = vadd.f32 1.0, %v2405_v42  ;;  %2591 = vadd.xlane.f32.xlu1 %v2590_v48  ;;  %4652 = vmatprep.subr.mxu1 %v3870_v60 }
 0x5d8   : > { %v2436_v50 = vmul.f32 %v2428_v47, %v2405_v42  ;;  %4628 = vmatprep.mubr.msk.f32.mxu0 %vm781_vm2, %v2442_v44  ;;  %v2587_v51 = vsel %vm781_vm2, %v2442_v44, 0.0  ;;  %v2445_v52 = vadd.f32 %v2437_v46, %v2421_v45  ;;  %4653 = vmatpush3.msra.mxu1 %v3870_v60  ;;  %v3874_v46 = vld [vmem:[%s5640_s2 + $0x70] sm:$0xff] }
 0x5d9   : > { %2588 = vadd.xlane.f32.xlu0 %v2587_v51  ;;  %4629 = vmatmul.mubr.msk.f32.gmra.mxu0 %vm781_vm2, %v2443_v43  ;;  %v3873_v51 = vld [vmem:[%s5640_s2 + $0x68] sm:$0xff] }
 0x5da   : > { %v2444_v53 = vadd.f32 %v2436_v50, %v2420_v49  ;;  %v2596_v54 = vsel %vm781_vm2, %v2445_v52, 0.0  ;;  %4654 = vmatprep.subr.mxu1 %v3869_v62 }
 0x5db   : > { %2597 = vadd.xlane.f32.xlu1 %v2596_v54  ;;  %4655 = vmatpush3.msra.mxu1 %v3869_v62  ;;  %v3872_v54 = vld [vmem:[%s5640_s2 + $0x60] sm:$0xff] }
 0x5dc   : > { %4631 = vmatprep.mubr.msk.f32.mxu0 %vm781_vm2, %v2444_v53  ;;  %v2593_v55 = vsel %vm781_vm2, %v2444_v53, 0.0  ;;  %4656 = vmatprep.subr.mxu1 %v3868_v6 }
 0x5dd   : > { %2594 = vadd.xlane.f32.xlu0 %v2593_v55  ;;  %4632 = vmatmul.mubr.msk.f32.gmra.mxu0 %vm781_vm2, %v2445_v52 }
 0x5de   : > { %4657 = vmatpush3.msra.mxu1 %v3868_v6 }
 0x5df   : > { %4659 = vmatmul.mubr.msk.f32.vlgmr.msra.gmra.mxu1 %vm247_vm0, %v5334_v63 }
 0x5e0   : > { %4661 = vmatprep.mubr.msk.f32.mxu1 %vm247_vm0, %v5339_v1 }
 0x5e3   : > { %4662 = vmatmul.mubr.msk.f32.gmra.mxu1 %vm247_vm0, %v5350_v17 }
 0x5e4   : > { %4664 = vmatprep.mubr.msk.f32.mxu1 %vm247_vm0, %v5355_v19 }
 0x5e7   : > { %4665 = vmatmul.mubr.msk.f32.gmra.mxu1 %vm247_vm0, %v5360_v20 }
 0x5e8   : > { %4667 = vmatprep.mubr.msk.f32.mxu1 %vm247_vm0, %v5365_v21 }
 0x5eb   : > { %4668 = vmatmul.mubr.msk.f32.gmra.mxu1 %vm247_vm0, %v5370_v8 }
 0x5ec   : > { %4698 = vmatprep.mubr.msk.f32.mxu1 %vm247_vm0, %v5326_v61 }
 0x658   : > { %v2580_v13 = vpop.xlane.xlu1 %2579 }
 0x659   : > { %v2600_v30 = vmax.f32 %v2580_v13, 1e-05 }
 0x65a   : > { %v2577_v7 = vpop.xlane.xlu0 %2576 }
 0x65b   : > { %v2599_v15 = vmax.f32 %v2577_v7, 1e-05 }
 0x65c   : > { %v2586_v29 = vpop.xlane.xlu1 %2585 }
 0x65d   : > { %4822 = vrcp.f32 %v2599_v15  ;;  %v2602_v18 = vmax.f32 %v2586_v29, 1e-05  ;;  %v3878_v29 = vld [vmem:[%s5641_s3 + $0x70] sm:$0xff]  ;;  %v3877_v15 = vld [vmem:[%s5641_s3 + $0x68] sm:$0xff] }
 0x65e   : > { %v2583_v28 = vpop.xlane.xlu0 %2582  ;;  %4824 = vrcp.f32 %v2600_v30  ;;  %v3876_v30 = vld [vmem:[%s5641_s3 + $0x60] sm:$0xff] }
 0x65f   : > { %v2601_v16 = vmax.f32 %v2583_v28, 1e-05 }
 0x660   : > { %v2592_v32 = vpop.xlane.xlu1 %2591 }
 0x661   : > { %4826 = vrcp.f32 %v2601_v16  ;;  %v2604_v34 = vmax.f32 %v2592_v32, 1e-05 }
 0x662   : > { %v2589_v31 = vpop.xlane.xlu0 %2588  ;;  %4828 = vrcp.f32 %v2602_v18 }
 0x663   : > { %v2603_v33 = vmax.f32 %v2589_v31, 1e-05 }
 0x664   : > { %v2598_v36 = vpop.xlane.xlu1 %2597 }
 0x665   : > { %4830 = vrcp.f32 %v2603_v33  ;;  %v2606_v38 = vmax.f32 %v2598_v36, 1e-05  ;;  %v1892_v33 = vadd.f32 %v5278_v5, %v5396_v24  ;;  %v1912_v24 = vadd.f32 %v5286_v14, %v5404_v27 }
 0x666   : > { %v2595_v35 = vpop.xlane.xlu0 %2594  ;;  %4832 = vrcp.f32 %v2604_v34 }
 0x667   : > { %v2605_v37 = vmax.f32 %v2595_v35, 1e-05 }
 0x669   : > { %4834 = vrcp.f32 %v2605_v37 }
 0x66a   : > { %v4823_v40 = vpop.eup %4822  ;;  %4836 = vrcp.f32 %v2606_v38 }
 0x66b   : > { %v4825_v42 = vpop.eup %4824 }
 0x66e   : > { %v4827_v47 = vpop.eup %4826 }
 0x66f   : > { %v4829_v49 = vpop.eup %4828 }
 0x672   : > { %v4831_v55 = vpop.eup %4830 }
 0x673   : > { %v4833_v57 = vpop.eup %4832 }
 0x676   : > { %v4835_v62 = vpop.eup %4834 }
 0x677   : > { %v4837_v7 = vpop.eup %4836 }
 0x691   : > { %v4624_v39 = vpop.f32.mrf.mxu0 }
 0x692   : > { %v2616_v44 = vmul.f32 %v4825_v42, %v4624_v39 }
 0x693   : > { %v2536_v41 = vpop.f32.mrf.mxu0 }
 0x694   : > { %v2615_v43 = vmul.f32 %v4823_v40, %v2536_v41 }
 0x695   : > { %v4627_v45 = vpop.f32.mrf.mxu0 }
 0x696   : > { %4638 = vmatprep.mubr.msk.f32.mxu0 %vm595_vm1, %v2615_v43  ;;  %v2618_v52 = vmul.f32 %v4829_v49, %v4627_v45 }
 0x697   : > { %v2546_v48 = vpop.f32.mrf.mxu0  ;;  %4639 = vmatmul.mubr.msk.f32.vlgmr.msra.gmra.mxu0 %vm595_vm1, %v2616_v44 }
 0x698   : > { %v2617_v50 = vmul.f32 %v4827_v47, %v2546_v48  ;;  %4671 = vmatpush3.msra.mxu0 %v3875_v58 }
 0x699   : > { %v4630_v53 = vpop.f32.mrf.mxu0  ;;  %4672 = vmatprep.subr.mxu0 %v3874_v46 }
 0x69a   : > { %4641 = vmatprep.mubr.msk.f32.mxu0 %vm595_vm1, %v2617_v50  ;;  %4673 = vmatpush3.msra.mxu0 %v3874_v46  ;;  %v2620_v59 = vmul.f32 %v4833_v57, %v4630_v53 }
 0x69b   : > { %v2556_v56 = vpop.f32.mrf.mxu0  ;;  %4642 = vmatmul.mubr.msk.f32.gmra.mxu0 %vm595_vm1, %v2618_v52  ;;  %4674 = vmatprep.subr.mxu0 %v3873_v51 }
 0x69c   : > { %v2619_v58 = vmul.f32 %v4831_v55, %v2556_v56  ;;  %4675 = vmatpush3.msra.mxu0 %v3873_v51 }
 0x69d   : > { %v4633_v60 = vpop.f32.mrf.mxu0  ;;  %4676 = vmatprep.subr.mxu0 %v3872_v54 }
 0x69e   : > { %4644 = vmatprep.mubr.msk.f32.mxu0 %vm595_vm1, %v2619_v58  ;;  %4677 = vmatpush3.msra.mxu0 %v3872_v54  ;;  %v2622_v28 = vmul.f32 %v4837_v7, %v4633_v60 }
 0x69f   : > { %v2566_v6 = vpop.f32.mrf.mxu0  ;;  %4645 = vmatmul.mubr.msk.f32.gmra.mxu0 %vm595_vm1, %v2620_v59  ;;  %v4660_v31 = vpop.f32.mrf.mxu1 }
 0x6a0   : > { %v2621_v13 = vmul.f32 %v4835_v62, %v2566_v6  ;;  %v2884_v46 = vmul.f32 0.25, %v4660_v31 }
 0x6a2   : > { %4647 = vmatprep.mubr.msk.f32.mxu0 %vm595_vm1, %v2621_v13 }
 0x6a3   : > { %4648 = vmatmul.mubr.msk.f32.gmra.mxu0 %vm595_vm1, %v2622_v28 }
 0x6a4   : > { %4678 = vmatprep.mubr.msk.f32.mxu0 %vm247_vm0, %v5326_v61  ;;  %v3879_v61 = vld [vmem:[%s5641_s3 + $0x78] sm:$0xff] }
 0x6a5   : > { %4690 = vmatprep.subr.mxu1 %v3879_v61 }
 0x6a6   : > { %4691 = vmatpush3.msra.mxu1 %v3879_v61 }
 0x6a7   : > { %4679 = vmatmul.mubr.msk.f32.vlgmr.msra.gmra.mxu0 %vm247_vm0, %v5334_v63  ;;  %4692 = vmatprep.subr.mxu1 %v3878_v29 }
 0x6a8   : > { %4681 = vmatprep.mubr.msk.f32.mxu0 %vm247_vm0, %v5339_v1  ;;  %4693 = vmatpush3.msra.mxu1 %v3878_v29 }
 0x6a9   : > { %4694 = vmatprep.subr.mxu1 %v3877_v15 }
 0x6aa   : > { %4695 = vmatpush3.msra.mxu1 %v3877_v15 }
 0x6ab   : > { %4682 = vmatmul.mubr.msk.f32.gmra.mxu0 %vm247_vm0, %v5350_v17  ;;  %4696 = vmatprep.subr.mxu1 %v3876_v30 }
 0x6ac   : > { %4684 = vmatprep.mubr.msk.f32.mxu0 %vm247_vm0, %v5355_v19  ;;  %4697 = vmatpush3.msra.mxu1 %v3876_v30 }
 0x6ad   : > { %4699 = vmatmul.mubr.msk.f32.vlgmr.msra.gmra.mxu1 %vm247_vm0, %v5334_v63  ;;  %v2844_v63 = vpop.f32.mrf.mxu1 }
 0x6ae   : > { %4701 = vmatprep.mubr.msk.f32.mxu1 %vm247_vm0, %v5339_v1  ;;  %v2883_v16 = vmul.f32 0.25, %v2844_v63  ;;  %v1887_v1 = vadd.f32 %v5266_v0, %v5390_v22  ;;  %v1907_v0 = vadd.f32 %v5280_v9, %v5398_v25 }
 0x6af   : > { %4685 = vmatmul.mubr.msk.f32.gmra.mxu0 %vm247_vm0, %v5360_v20  ;;  %v4663_v14 = vpop.f32.mrf.mxu1 }
 0x6b0   : > { %4687 = vmatprep.mubr.msk.f32.mxu0 %vm247_vm0, %v5365_v21  ;;  %v2886_v49 = vmul.f32 0.25, %v4663_v14 }
 0x6b1   : > { %4702 = vmatmul.mubr.msk.f32.gmra.mxu1 %vm247_vm0, %v5350_v17 }
 0x6b2   : > { %4704 = vmatprep.mubr.msk.f32.mxu1 %vm247_vm0, %v5355_v19  ;;  %v1882_v19 = vadd.f32 %v5274_v2, %v5392_v23  ;;  %v1902_v23 = vadd.f32 %v5282_v3, %v5400_v12 }
 0x6b3   : > { %4688 = vmatmul.mubr.msk.f32.gmra.mxu0 %vm247_vm0, %v5370_v8 }
 0x6b4   : > { %4726 = vmatprep.mubr.msk.f32.mxu0 %vm595_vm1, %v2883_v16 }
 0x6b5   : > { %4705 = vmatmul.mubr.msk.f32.gmra.mxu1 %vm247_vm0, %v5360_v20 }
 0x6b6   : > { %4707 = vmatprep.mubr.msk.f32.mxu1 %vm247_vm0, %v5365_v21  ;;  %v1897_v21 = vadd.f32 %v5276_v4, %v5394_v10  ;;  %v1917_v10 = vadd.f32 %v5284_v11, %v5402_v26  ;;  %v2854_v26 = vpop.f32.mrf.mxu1 }
 0x6b7   : > { %v2885_v45 = vmul.f32 0.25, %v2854_v26 }
 0x6b8   : > { %v4666_v27 = vpop.f32.mrf.mxu1 }
 0x6b9   : > { %4708 = vmatmul.mubr.msk.f32.gmra.mxu1 %vm247_vm0, %v5370_v8  ;;  %v2888_v52 = vmul.f32 0.25, %v4666_v27 }
 0x6ba   : > { %v2864_v44 = vpop.f32.mrf.mxu1 }
 0x6bb   : > { %v2887_v48 = vmul.f32 0.25, %v2864_v44 }
 0x6bc   : > { %v4669_v47 = vpop.f32.mrf.mxu1 }
 0x6bd   : > { %v2890_v53 = vmul.f32 0.25, %v4669_v47 }
 0x6be   : > { %v2874_v50 = vpop.f32.mrf.mxu1 }
 0x6bf   : > { %v2889_v51 = vmul.f32 0.25, %v2874_v50 }
 0x757   : > { %v4640_v17 = vpop.f32.mrf.mxu0 }
 0x758   : > { %v5533_v32 = vadd.f32 %v4640_v17, %v1887_v1 }
 0x759   : > { %v2713_v20 = vpop.f32.mrf.mxu0 }
 0x75a   : > { %v5537_v18 = vadd.f32 %v2713_v20, %v1882_v19 }
 0x75b   : > { %v4643_v8 = vpop.f32.mrf.mxu0 }
 0x75c   : > { %v5541_v34 = vadd.f32 %v4643_v8, %v1897_v21 }
 0x75d   : > { %v2723_v35 = vpop.f32.mrf.mxu0 }
 0x75e   : > { %v5545_v22 = vadd.f32 %v2723_v35, %v1892_v33 }
 0x75f   : > { %v4646_v2 = vpop.f32.mrf.mxu0 }
 0x760   : > { %v5549_v36 = vadd.f32 %v4646_v2, %v1907_v0 }
 0x761   : > { %v2733_v4 = vpop.f32.mrf.mxu0 }
 0x762   : > { %v5553_v37 = vadd.f32 %v2733_v4, %v1902_v23 }
 0x763   : > { %v4649_v5 = vpop.f32.mrf.mxu0 }
 0x764   : > { %v5557_v38 = vadd.f32 %v4649_v5, %v1917_v10 }
 0x765   : > { %v2743_v9 = vpop.f32.mrf.mxu0 }
 0x766   : > { %v5559_v25 = vadd.f32 %v2743_v9, %v1912_v24 }
 0x767   : > { %v4680_v39 = vpop.f32.mrf.mxu0 }
 0x769   : > { %v2957_v40 = vpop.f32.mrf.mxu0 }
 0x76b   : > { %v4683_v3 = vpop.f32.mrf.mxu0 }
 0x76d   : > { %v2967_v12 = vpop.f32.mrf.mxu0  ;;  %v4700_v54 = vpop.f32.mrf.mxu1 }
 0x76f   : > { %v4686_v41 = vpop.f32.mrf.mxu0  ;;  %v3062_v55 = vpop.f32.mrf.mxu1 }
 0x771   : > { %v2977_v42 = vpop.f32.mrf.mxu0  ;;  %v4703_v56 = vpop.f32.mrf.mxu1 }
 0x773   : > { %v4689_v43 = vpop.f32.mrf.mxu0  ;;  %v3072_v57 = vpop.f32.mrf.mxu1 }
 0x774   : > { %4710 = vmatprep.subr.msk.mxu0 %vm595_vm1, %v4689_v43 }
 0x775   : > { %v2987_v11 = vpop.f32.mrf.mxu0  ;;  %4711 = vmatpush3.xpose.msk.msra.mxu0 %vm595_vm1, %v4689_v43  ;;  %v4706_v58 = vpop.f32.mrf.mxu1 }
 0x776   : > { %4712 = vmatprep.subr.msk.mxu0 %vm595_vm1, %v2987_v11 }
 0x777   : > { %v3082_v59 = vpop.f32.mrf.mxu1 }
 0x779   : > { %4713 = vmatpush3.xpose.msk.msra.mxu0 %vm595_vm1, %v2987_v11  ;;  %v4709_v60 = vpop.f32.mrf.mxu1 }
 0x77a   : > { %4714 = vmatprep.subr.msk.mxu0 %vm595_vm1, %v4686_v41  ;;  %4738 = vmatprep.subr.mxu1 %v4709_v60 }
 0x77b   : > { %v3092_v62 = vpop.f32.mrf.mxu1  ;;  %4739 = vmatpush3.msra.mxu1 %v4709_v60 }
 0x77c   : > { %4740 = vmatprep.subr.mxu1 %v3092_v62 }
 0x77d   : > { %4715 = vmatpush3.xpose.msk.msra.mxu0 %vm595_vm1, %v4686_v41  ;;  %4741 = vmatpush3.msra.mxu1 %v3092_v62 }
 0x77e   : > { %4716 = vmatprep.subr.msk.mxu0 %vm595_vm1, %v2977_v42  ;;  %4742 = vmatprep.subr.mxu1 %v4706_v58 }
 0x77f   : > { %4743 = vmatpush3.msra.mxu1 %v4706_v58 }
 0x780   : > { %4744 = vmatprep.subr.mxu1 %v3082_v59 }
 0x781   : > { %4717 = vmatpush3.xpose.msk.msra.mxu0 %vm595_vm1, %v2977_v42  ;;  %4745 = vmatpush3.msra.mxu1 %v3082_v59 }
 0x782   : > { %4718 = vmatprep.subr.msk.mxu0 %vm595_vm1, %v4683_v3  ;;  %4746 = vmatprep.subr.mxu1 %v4703_v56 }
 0x783   : > { %4747 = vmatpush3.msra.mxu1 %v4703_v56 }
 0x784   : > { %4748 = vmatprep.subr.mxu1 %v3072_v57 }
 0x785   : > { %4719 = vmatpush3.xpose.msk.msra.mxu0 %vm595_vm1, %v4683_v3  ;;  %4749 = vmatpush3.msra.mxu1 %v3072_v57 }
 0x786   : > { %4720 = vmatprep.subr.msk.mxu0 %vm595_vm1, %v2967_v12  ;;  %4750 = vmatprep.subr.mxu1 %v4700_v54 }
 0x787   : > { %4751 = vmatpush3.msra.mxu1 %v4700_v54  ;;  %v3881_v54 = vld [vmem:[%s5642_s4 + $0x38] sm:$0xff] }
 0x788   : > { %4752 = vmatprep.subr.mxu1 %v3062_v55 }
 0x789   : > { %4721 = vmatpush3.xpose.msk.msra.mxu0 %vm595_vm1, %v2967_v12  ;;  %4753 = vmatpush3.msra.mxu1 %v3062_v55  ;;  %v3880_v55 = vld [vmem:[%s5642_s4 + $0x30] sm:$0xff] }
 0x78a   : > { %4722 = vmatprep.subr.msk.mxu0 %vm595_vm1, %v4680_v39  ;;  %4766 = vmatprep.subr.mxu1 %v3881_v54 }
 0x78d   : > { %4723 = vmatpush3.xpose.msk.msra.mxu0 %vm595_vm1, %v4680_v39 }
 0x78e   : > { %4724 = vmatprep.subr.msk.mxu0 %vm595_vm1, %v2957_v40 }
 0x791   : > { %4725 = vmatpush3.xpose.msk.msra.mxu0 %vm595_vm1, %v2957_v40 }
 0x794   : > { %4727 = vmatmul.mubr.msk.f32.vlgmr.msra.gmra.mxu0 %vm595_vm1, %v2884_v46 }
 0x795   : > { %4729 = vmatprep.mubr.msk.f32.mxu0 %vm595_vm1, %v2885_v45 }
 0x798   : > { %4730 = vmatmul.mubr.msk.f32.gmra.mxu0 %vm595_vm1, %v2886_v49 }
 0x799   : > { %4732 = vmatprep.mubr.msk.f32.mxu0 %vm595_vm1, %v2887_v48 }
 0x79c   : > { %4733 = vmatmul.mubr.msk.f32.gmra.mxu0 %vm595_vm1, %v2888_v52 }
 0x79d   : > { %4735 = vmatprep.mubr.msk.f32.mxu0 %vm595_vm1, %v2889_v51 }
 0x7a0   : > { %4736 = vmatmul.mubr.msk.f32.gmra.mxu0 %vm595_vm1, %v2890_v53 }
 0x854   : > { %v4728_v6 = vpop.f32.mrf.mxu0 }
 0x855   : > { %v3263_v7 = vmul.f32 0.5, %v4728_v6  ;;  %v3255_v28 = vadd.f32 1.0, %v4728_v6 }
 0x856   : > { %v3215_v13 = vpop.f32.mrf.mxu0 }
 0x857   : > { %v3271_v61 = vmul.f32 %v4728_v6, %v3263_v7  ;;  %v3262_v29 = vmul.f32 0.5, %v3215_v13  ;;  %v3254_v30 = vadd.f32 1.0, %v3215_v13 }
 0x858   : > { %v4731_v15 = vpop.f32.mrf.mxu0 }
 0x859   : > { %v3270_v31 = vmul.f32 %v3262_v29, %v3215_v13  ;;  %v3265_v63 = vmul.f32 0.5, %v4731_v15  ;;  %v3279_v16 = vadd.f32 %v3271_v61, %v3255_v28  ;;  %v3257_v21 = vadd.f32 1.0, %v4731_v15 }
 0x85a   : > { %v3225_v1 = vpop.f32.mrf.mxu0 }
 0x85b   : > { %v3278_v17 = vadd.f32 %v3270_v31, %v3254_v30  ;;  %v3273_v19 = vmul.f32 %v4731_v15, %v3265_v63  ;;  %v3264_v20 = vmul.f32 0.5, %v3225_v1  ;;  %v3418_v8 = vsel %vm781_vm2, %v3279_v16, 0.0 }
 0x85c   : > { %v4734_v33 = vpop.f32.mrf.mxu0  ;;  %v3256_v35 = vadd.f32 1.0, %v3225_v1  ;;  %3419 = vadd.xlane.f32.xlu1 %v3418_v8 }
 0x85d   : > { %v3272_v0 = vmul.f32 %v3264_v20, %v3225_v1  ;;  %v3267_v2 = vmul.f32 0.5, %v4734_v33  ;;  %4754 = vmatprep.mubr.msk.f32.mxu1 %vm781_vm2, %v3278_v17  ;;  %v3415_v23 = vsel %vm781_vm2, %v3278_v17, 0.0  ;;  %v3281_v10 = vadd.f32 %v3273_v19, %v3257_v21 }
 0x85e   : > { %3416 = vadd.xlane.f32.xlu0 %v3415_v23  ;;  %v3235_v4 = vpop.f32.mrf.mxu0  ;;  %4755 = vmatmul.mubr.msk.f32.vlgmr.msra.gmra.mxu1 %vm781_vm2, %v3279_v16  ;;  %v3259_v39 = vadd.f32 1.0, %v4734_v33 }
 0x85f   : > { %v3280_v5 = vadd.f32 %v3272_v0, %v3256_v35  ;;  %v3275_v24 = vmul.f32 %v4734_v33, %v3267_v2  ;;  %v3266_v9 = vmul.f32 0.5, %v3235_v4  ;;  %v3424_v40 = vsel %vm781_vm2, %v3281_v10, 0.0  ;;  %4767 = vmatpush3.msra.mxu1 %v3881_v54 }
 0x860   : > { %v4737_v3 = vpop.f32.mrf.mxu0  ;;  %v3258_v12 = vadd.f32 1.0, %v3235_v4  ;;  %3425 = vadd.xlane.f32.xlu1 %v3424_v40  ;;  %4768 = vmatprep.subr.mxu1 %v3880_v55 }
 0x861   : > { %v3274_v41 = vmul.f32 %v3266_v9, %v3235_v4  ;;  %v3269_v42 = vmul.f32 0.5, %v4737_v3  ;;  %4757 = vmatprep.mubr.msk.f32.mxu1 %vm781_vm2, %v3280_v5  ;;  %v3421_v43 = vsel %vm781_vm2, %v3280_v5, 0.0  ;;  %v3283_v14 = vadd.f32 %v3275_v24, %v3259_v39  ;;  %4769 = vmatpush3.msra.mxu1 %v3880_v55 }
 0x862   : > { %3422 = vadd.xlane.f32.xlu0 %v3421_v43  ;;  %v3245_v11 = vpop.f32.mrf.mxu0  ;;  %4758 = vmatmul.mubr.msk.f32.gmra.mxu1 %vm781_vm2, %v3281_v10  ;;  %v3261_v27 = vadd.f32 1.0, %v4737_v3 }
 0x863   : > { %v3282_v26 = vadd.f32 %v3274_v41, %v3258_v12  ;;  %v3277_v44 = vmul.f32 %v4737_v3, %v3269_v42  ;;  %v3268_v45 = vmul.f32 0.5, %v3245_v11  ;;  %v3430_v46 = vsel %vm781_vm2, %v3283_v14, 0.0 }
 0x864   : > { %v3260_v47 = vadd.f32 1.0, %v3245_v11  ;;  %3431 = vadd.xlane.f32.xlu1 %v3430_v46 }
 0x865   : > { %v3276_v48 = vmul.f32 %v3268_v45, %v3245_v11  ;;  %4760 = vmatprep.mubr.msk.f32.mxu1 %vm781_vm2, %v3282_v26  ;;  %v3427_v49 = vsel %vm781_vm2, %v3282_v26, 0.0  ;;  %v3285_v50 = vadd.f32 %v3277_v44, %v3261_v27 }
 0x866   : > { %3428 = vadd.xlane.f32.xlu0 %v3427_v49  ;;  %4761 = vmatmul.mubr.msk.f32.gmra.mxu1 %vm781_vm2, %v3283_v14 }
 0x867   : > { %v3284_v51 = vadd.f32 %v3276_v48, %v3260_v47  ;;  %v3436_v52 = vsel %vm781_vm2, %v3285_v50, 0.0 }
 0x868   : > { %3437 = vadd.xlane.f32.xlu1 %v3436_v52 }
 0x869   : > { %4763 = vmatprep.mubr.msk.f32.mxu1 %vm781_vm2, %v3284_v51  ;;  %v3433_v53 = vsel %vm781_vm2, %v3284_v51, 0.0 }
 0x86a   : > { %3434 = vadd.xlane.f32.xlu0 %v3433_v53  ;;  %4764 = vmatmul.mubr.msk.f32.gmra.mxu1 %vm781_vm2, %v3285_v50 }
 0x8e5   : > { %v3420_v57 = vpop.xlane.xlu1 %3419 }
 0x8e6   : > { %v3440_v62 = vmax.f32 %v3420_v57, 1e-05 }
 0x8e7   : > { %v3417_v56 = vpop.xlane.xlu0 %3416 }
 0x8e8   : > { %v3439_v60 = vmax.f32 %v3417_v56, 1e-05 }
 0x8e9   : > { %v3426_v59 = vpop.xlane.xlu1 %3425 }
 0x8ea   : > { %4838 = vrcp.f32 %v3439_v60  ;;  %v3442_v28 = vmax.f32 %v3426_v59, 1e-05 }
 0x8eb   : > { %v3423_v58 = vpop.xlane.xlu0 %3422  ;;  %4840 = vrcp.f32 %v3440_v62 }
 0x8ec   : > { %v3441_v7 = vmax.f32 %v3423_v58, 1e-05 }
 0x8ed   : > { %v3432_v13 = vpop.xlane.xlu1 %3431 }
 0x8ee   : > { %4842 = vrcp.f32 %v3441_v7  ;;  %v3444_v29 = vmax.f32 %v3432_v13, 1e-05 }
 0x8ef   : > { %v3429_v6 = vpop.xlane.xlu0 %3428  ;;  %4844 = vrcp.f32 %v3442_v28 }
 0x8f0   : > { %v3443_v61 = vmax.f32 %v3429_v6, 1e-05 }
 0x8f1   : > { %v3438_v30 = vpop.xlane.xlu1 %3437 }
 0x8f2   : > { %4846 = vrcp.f32 %v3443_v61  ;;  %v3446_v63 = vmax.f32 %v3438_v30, 1e-05 }
 0x8f3   : > { %v3435_v15 = vpop.xlane.xlu0 %3434  ;;  %4848 = vrcp.f32 %v3444_v29 }
 0x8f4   : > { %v3445_v31 = vmax.f32 %v3435_v15, 1e-05 }
 0x8f6   : > { %4850 = vrcp.f32 %v3445_v31 }
 0x8f7   : > { %v4839_v1 = vpop.eup %4838  ;;  %4852 = vrcp.f32 %v3446_v63 }
 0x8f8   : > { %v4841_v19 = vpop.eup %4840 }
 0x8fb   : > { %v4843_v33 = vpop.eup %4842 }
 0x8fc   : > { %v4845_v0 = vpop.eup %4844 }
 0x8ff   : > { %v4847_v10 = vpop.eup %4846 }
 0x900   : > { %v4849_v24 = vpop.eup %4848 }
 0x903   : > { %v4851_v3 = vpop.eup %4850 }
 0x904   : > { %v4853_v41 = vpop.eup %4852 }
 0x91e   : > { %v4756_v16 = vpop.f32.mrf.mxu1 }
 0x91f   : > { %v3456_v21 = vmul.f32 %v4841_v19, %v4756_v16 }
 0x920   : > { %v3376_v17 = vpop.f32.mrf.mxu1 }
 0x921   : > { %v3455_v20 = vmul.f32 %v4839_v1, %v3376_v17 }
 0x922   : > { %v4759_v8 = vpop.f32.mrf.mxu1 }
 0x923   : > { %4770 = vmatprep.mubr.msk.f32.mxu1 %vm595_vm1, %v3455_v20  ;;  %v3458_v23 = vmul.f32 %v4845_v0, %v4759_v8 }
 0x924   : > { %v3386_v35 = vpop.f32.mrf.mxu1  ;;  %4771 = vmatmul.mubr.msk.f32.vlgmr.msra.gmra.mxu1 %vm595_vm1, %v3456_v21 }
 0x925   : > { %v3457_v2 = vmul.f32 %v4843_v33, %v3386_v35 }
 0x926   : > { %v4762_v4 = vpop.f32.mrf.mxu1 }
 0x927   : > { %4773 = vmatprep.mubr.msk.f32.mxu1 %vm595_vm1, %v3457_v2  ;;  %v3460_v39 = vmul.f32 %v4849_v24, %v4762_v4 }
 0x928   : > { %v3396_v5 = vpop.f32.mrf.mxu1  ;;  %4774 = vmatmul.mubr.msk.f32.gmra.mxu1 %vm595_vm1, %v3458_v23 }
 0x929   : > { %v3459_v9 = vmul.f32 %v4847_v10, %v3396_v5 }
 0x92a   : > { %v4765_v40 = vpop.f32.mrf.mxu1 }
 0x92b   : > { %4776 = vmatprep.mubr.msk.f32.mxu1 %vm595_vm1, %v3459_v9  ;;  %v3462_v43 = vmul.f32 %v4853_v41, %v4765_v40 }
 0x92c   : > { %v3406_v12 = vpop.f32.mrf.mxu1  ;;  %4777 = vmatmul.mubr.msk.f32.gmra.mxu1 %vm595_vm1, %v3460_v39 }
 0x92d   : > { %v3461_v42 = vmul.f32 %v4851_v3, %v3406_v12 }
 0x92f   : > { %4779 = vmatprep.mubr.msk.f32.mxu1 %vm595_vm1, %v3461_v42 }
 0x930   : > { %4780 = vmatmul.mubr.msk.f32.gmra.mxu1 %vm595_vm1, %v3462_v43 }
 0x9e4   : > { %v4772_v11 = vpop.f32.mrf.mxu1 }
 0x9e5   : > { %v3593_v14 = vadd.f32 %v4772_v11, %v5533_v32 }
 0x9e6   : > { %v3553_v26 = vpop.f32.mrf.mxu1 }
 0x9e7   : > { %3601 = vst.msk [vmem:[%s224_s29 + $0x8] sm:$0xff] %vm247_vm0, %v3593_v14  ;;  %v3592_v27 = vadd.f32 %v3553_v26, %v5537_v18 }
 0x9e8   : > { %v4775_v44 = vpop.f32.mrf.mxu1 }
 0x9e9   : > { %3600 = vst.msk [vmem:[%s224_s29] sm:$0xff] %vm247_vm0, %v3592_v27  ;;  %v3595_v45 = vadd.f32 %v4775_v44, %v5541_v34 }
 0x9ea   : > { %v3563_v46 = vpop.f32.mrf.mxu1 }
 0x9eb   : > { %3603 = vst.msk [vmem:[%s224_s29 + $0x18] sm:$0xff] %vm247_vm0, %v3595_v45  ;;  %v3594_v47 = vadd.f32 %v3563_v46, %v5545_v22 }
 0x9ec   : > { %v4778_v48 = vpop.f32.mrf.mxu1 }
 0x9ed   : > { %3602 = vst.msk [vmem:[%s224_s29 + $0x10] sm:$0xff] %vm247_vm0, %v3594_v47  ;;  %v3597_v32 = vadd.f32 %v4778_v48, %v5549_v36 }
 0x9ee   : > { %v3573_v49 = vpop.f32.mrf.mxu1 }
 0x9ef   : > { %3605 = vst.msk [vmem:[%s224_s29 + $0x28] sm:$0xff] %vm247_vm0, %v3597_v32  ;;  %v3596_v18 = vadd.f32 %v3573_v49, %v5553_v37 }
 0x9f0   : > { %v4781_v50 = vpop.f32.mrf.mxu1 }
 0x9f1   : > { %3604 = vst.msk [vmem:[%s224_s29 + $0x20] sm:$0xff] %vm247_vm0, %v3596_v18  ;;  %v3599_v34 = vadd.f32 %v4781_v50, %v5557_v38 }
 0x9f2   : > { %v3583_v51 = vpop.f32.mrf.mxu1 }
 0x9f3   : > { %3607 = vst.msk [vmem:[%s224_s29 + $0x38] sm:$0xff] %vm247_vm0, %v3599_v34  ;;  %v3598_v22 = vadd.f32 %v3583_v51, %v5559_v25 }
 0x9f5   : > { %3606 = vst.msk [vmem:[%s224_s29 + $0x30] sm:$0xff] %vm247_vm0, %v3598_v22 }
 0x9f6 PF: > { %s15_s18 = sadd.s32 1, %s4868_s18  }
 0x9f7   : > { %p12_p4 = scmp.ge.s32.totalorder %s15_s18, 4  }
 0x9f9   :  { %14 = sbr.rel (!%p12_p4) target bundleno = 1 (0x1), region = 82 }

</bundles_post_ra>
